<compile_context>
chip_gen: v6e
topology: v6e:2x2x1
jax: 0.10.0
libtpu: 0.0.40
codegen_flags: <defaults>
</compile_context>

<pallas_src>
import jax
import jax.numpy as jnp
import numpy as np
from jax.experimental import pallas as pl
from jax.experimental.pallas import tpu as pltpu


# ----------------------------------------------------------------------------
# Fused kernel: conv block + 2-layer GRU + FC.  Everything stays in VMEM.
# ----------------------------------------------------------------------------
def _make_kernel(B_sub, L, C, H, NC, bo, w8o, w32o):
    """Builds the kernel as a closure over static shapes / pack offsets."""
    T = L // 4
    f32, bf16 = jnp.float32, jnp.bfloat16

    def kernel(x_ref, bias_ref, w8_ref, w32_ref, out_ref, y1_scr, y2_scr):
        R1 = B_sub * L           # conv1 rows (flattened batch*length)
        R2 = R1 // 2             # conv2 rows

        # ---- packed parameter views (static lane slices) ----
        w1row = bias_ref[:, bo['w1']:bo['w1'] + 3 * C]            # (1, 3C)  f32
        b1    = bias_ref[:, bo['b1']:bo['b1'] + C]
        b2    = bias_ref[:, bo['b2']:bo['b2'] + C]
        bih1  = bias_ref[:, bo['bih1']:bo['bih1'] + 3 * H]
        bcomb = bias_ref[:, bo['bcomb']:bo['bcomb'] + 6 * H]
        bhh1  = bias_ref[:, bo['bhh1']:bo['bhh1'] + 3 * H]
        bhh2  = bias_ref[:, bo['bhh2']:bo['bhh2'] + 3 * H]
        fcb   = bias_ref[:, bo['fcb']:bo['fcb'] + NC]
        w2    = w8_ref[:, w8o['w2']:w8o['w2'] + 3 * C]            # (C, 3C) bf16
        wih1  = w8_ref[:, w8o['wih1']:w8o['wih1'] + 3 * H]        # (C, 3H) bf16
        wcomb = w32_ref[:, w32o['wcomb']:w32o['wcomb'] + 6 * H]   # (H, 6H) bf16
        whh2  = w32_ref[:, w32o['whh2']:w32o['whh2'] + 3 * H]     # (H, 3H) bf16
        fcw   = w32_ref[:, w32o['fcw']:w32o['fcw'] + NC]          # (H, NC) bf16

        def conv_taps_to_out(z, Lseg, bias):
            # z[:, k*C:(k+1)*C] holds the tap-k contribution computed at the
            # *input* position.  Shift taps 0/2 by one row along the flattened
            # (batch*length) sublane axis and zero them at batch-segment
            # boundaries ('same' / pad=1 conv per batch element), add bias, ReLU.
            R = z.shape[0]
            zk0, zk1, zk2 = z[:, 0:C], z[:, C:2 * C], z[:, 2 * C:3 * C]
            row = jax.lax.broadcasted_iota(jnp.int32, (R, C), 0)
            pos = (row & (Lseg - 1)) if (Lseg & (Lseg - 1)) == 0 else row % Lseg
            prev = jnp.where(pos == 0, 0.0, pltpu.roll(zk0, shift=1, axis=0))
            nxt = jnp.where(pos == Lseg - 1, 0.0,
                            pltpu.roll(zk2, shift=R - 1, axis=0))
            return jnp.maximum(prev + zk1 + nxt + bias, 0.0)

        # ---- conv1 (Cin == 1): VPU broadcast outer product, no MXU ----
        z1 = x_ref[...] * w1row                                   # (R1, 3C) f32
        y1_scr[...] = conv_taps_to_out(z1, L, b1)

        # ---- MaxPool1d(2): stride-2 reads of the scratch ----
        p1 = jnp.maximum(y1_scr[pl.ds(0, R2, stride=2), :],
                         y1_scr[pl.ds(1, R2, stride=2), :])       # (R2, C)

        # ---- conv2 (K = C >= 8 -> MXU; bf16 operands, f32 accumulate) ----
        z2 = jnp.dot(p1.astype(bf16), w2, preferred_element_type=f32)
        y2_scr[...] = conv_taps_to_out(z2, L // 2, b2)

        # ---- MaxPool1d(2) read out directly in TIME-MAJOR order ----
        # feat_tm row = t*B_sub + b ; all strided gathers happen here, once,
        # before (and off) the serialized recurrent chain.
        Lh = L // 2
        feat_tm = jnp.concatenate(
            [jnp.maximum(y2_scr[pl.ds(2 * t, B_sub, stride=Lh), :],
                         y2_scr[pl.ds(2 * t + 1, B_sub, stride=Lh), :])
             for t in range(T)], axis=0)                          # (T*B_sub, C)

        # ---- hoisted GRU layer-1 input projection: ONE matmul for all (t,b) ----
        gi1_all = jnp.dot(feat_tm.astype(bf16), wih1,
                          preferred_element_type=f32) + bih1      # (T*B_sub, 3H)

        h1 = jnp.zeros((B_sub, H), f32)
        h2 = jnp.zeros((B_sub, H), f32)
        # h == 0  =>  recurrent-side gate pre-activations are just the biases.
        gh1 = jnp.zeros((B_sub, 3 * H), f32) + bhh1
        gh2 = jnp.zeros((B_sub, 3 * H), f32) + bhh2

        # ---- fully unrolled recurrence (T static & small) ----
        for t in range(T):
            gi1 = gi1_all[t * B_sub:(t + 1) * B_sub, :]   # contiguous value slice

            # layer 1 (PyTorch gate order r, z, n)
            r1 = jax.nn.sigmoid(gi1[:, 0:H] + gh1[:, 0:H])
            u1 = jax.nn.sigmoid(gi1[:, H:2 * H] + gh1[:, H:2 * H])
            n1 = jnp.tanh(gi1[:, 2 * H:3 * H] + r1 * gh1[:, 2 * H:3 * H])
            h1 = n1 + u1 * (h1 - n1)

            # one fused dot on the fresh h1: this step's layer-2 input gates
            # AND next step's layer-1 recurrent gates.
            m = jnp.dot(h1.astype(bf16), wcomb, preferred_element_type=f32) + bcomb
            gi2 = m[:, 0:3 * H]
            gh1 = m[:, 3 * H:6 * H]

            # layer 2
            r2 = jax.nn.sigmoid(gi2[:, 0:H] + gh2[:, 0:H])
            u2 = jax.nn.sigmoid(gi2[:, H:2 * H] + gh2[:, H:2 * H])
            n2 = jnp.tanh(gi2[:, 2 * H:3 * H] + r2 * gh2[:, 2 * H:3 * H])
            h2 = n2 + u2 * (h2 - n2)

            if t + 1 < T:
                # layer-2 recurrent gates for the next step; independent of the
                # next step's layer-1 work, so it overlaps.
                gh2 = jnp.dot(h2.astype(bf16), whh2,
                              preferred_element_type=f32) + bhh2

        # ---- final FC on the last layer-2 hidden state ----
        out_ref[...] = (jnp.dot(h2.astype(bf16), fcw, preferred_element_type=f32)
                        + fcb).astype(out_ref.dtype)

    return kernel


# ----------------------------------------------------------------------------
# Wrapper: parameter packing / plumbing only.
# ----------------------------------------------------------------------------
def _pack_lanes(mats, dtype, align=128):
    """Concat 2-D arrays along lanes; every segment starts 128-lane aligned."""
    parts, offs, off = [], [], 0
    for m in mats:
        w = m.shape[1]
        slot = ((w + align - 1) // align) * align
        parts.append(jnp.pad(m.astype(dtype), ((0, 0), (0, slot - w))))
        offs.append(off)
        off += slot
    return jnp.concatenate(parts, axis=1), offs


def cnn_gru_forward(x_ncl, params):
    B, Cin, L = x_ncl.shape
    C = params['conv1_w'].shape[0]
    H = params['gru_whh_l0'].shape[1]
    NC = params['fc_w'].shape[0]
    f32, bf16 = jnp.float32, jnp.bfloat16

    assert Cin == 1, "conv1 is specialised to a VPU outer product for Cin == 1"
    # TODO(synk): for Cin >= 8 route conv1 back through an MXU dot like conv2.
    assert L % 4 == 0, "two MaxPool1d(2) stages require L % 4 == 0"
    T = L // 4

    # Batch grid: <=8 batch rows per program; shards across v7x's 2 TensorCores
    # via "parallel"; degenerates to grid=(1,) at small B (no serialization).
    B_sub = B if B <= 8 else 8
    assert B % B_sub == 0, "pad the batch to a multiple of 8 when B > 8"
    grid = (B // B_sub,)

    # conv input: (B*L, Cin), batch-major along the sublane axis
    xf = jnp.transpose(x_ncl, (0, 2, 1)).reshape(B * L, Cin).astype(f32)

    # conv weights: the 3 taps side by side on the lane axis
    w1row = params['conv1_w'][:, 0, :].T.reshape(1, 3 * C)             # (1, 3C)
    w2cat = jnp.concatenate([params['conv2_w'][:, :, k].T for k in range(3)],
                            axis=1)                                     # (C, 3C)

    # GRU: hoisted layer-1 input projection + fused recurrent weights
    wih1 = params['gru_wih_l0'].T                                       # (C, 3H)
    wcomb = jnp.concatenate([params['gru_wih_l1'].T,                    # (H, 6H)
                             params['gru_whh_l0'].T], axis=1)
    whh2 = params['gru_whh_l1'].T                                       # (H, 3H)
    fcw = params['fc_w'].T                                              # (H, NC)

    # ---- pack the many tiny operands into 3 inputs (fewer input DMAs) ----
    bias_pack, boffs = _pack_lanes(
        [w1row,
         params['conv1_b'].reshape(1, C),
         params['conv2_b'].reshape(1, C),
         params['gru_bih_l0'].reshape(1, 3 * H),
         jnp.concatenate([params['gru_bih_l1'],
                          params['gru_bhh_l0']]).reshape(1, 6 * H),
         params['gru_bhh_l0'].reshape(1, 3 * H),
         params['gru_bhh_l1'].reshape(1, 3 * H),
         params['fc_b'].reshape(1, NC)], f32)
    w8_pack, w8offs = _pack_lanes([w2cat, wih1], bf16)      # MXU operands: bf16
    w32_pack, w32offs = _pack_lanes([wcomb, whh2, fcw], bf16)

    bo = dict(zip(['w1', 'b1', 'b2', 'bih1', 'bcomb', 'bhh1', 'bhh2', 'fcb'],
                  boffs))
    w8o = dict(zip(['w2', 'wih1'], w8offs))
    w32o = dict(zip(['wcomb', 'whh2', 'fcw'], w32offs))

    kernel = _make_kernel(B_sub, L, C, H, NC, bo, w8o, w32o)

    return pl.pallas_call(
        kernel,
        out_shape=jax.ShapeDtypeStruct((B, NC), f32),
        grid_spec=pltpu.PrefetchScalarGridSpec(
            num_scalar_prefetch=0,
            grid=grid,
            in_specs=[pl.BlockSpec((B_sub * L, Cin), lambda i: (i, 0)),
                      pl.BlockSpec(bias_pack.shape, lambda i: (0, 0)),
                      pl.BlockSpec(w8_pack.shape, lambda i: (0, 0)),
                      pl.BlockSpec(w32_pack.shape, lambda i: (0, 0))],
            out_specs=pl.BlockSpec((B_sub, NC), lambda i: (i, 0)),
            scratch_shapes=[pltpu.VMEM((B_sub * L, C), f32),
                            pltpu.VMEM((B_sub * L // 2, C), f32)]),
        compiler_params=pltpu.CompilerParams(
            dimension_semantics=("parallel",)),
    )(xf, bias_pack, w8_pack, w32_pack)


# ----------------------------------------------------------------------------
# Pure-JAX f32 reference (mirrors the PyTorch forward in eval mode)
# ----------------------------------------------------------------------------
def reference_forward(x, params):
    def conv1d_same(xin, w, b):                  # xin (B,Cin,L), w (Cout,Cin,3)
        L = xin.shape[2]
        xp = jnp.pad(xin, ((0, 0), (0, 0), (1, 1)))
        y = sum(jnp.einsum('oi,bil->bol', w[:, :, k], xp[:, :, k:k + L])
                for k in range(3))
        return y + b[None, :, None]

    def pool(xin):                               # MaxPool1d(2)
        B, C, L = xin.shape
        return xin.reshape(B, C, L // 2, 2).max(-1)

    h = pool(jax.nn.relu(conv1d_same(x, params['conv1_w'], params['conv1_b'])))
    h = pool(jax.nn.relu(conv1d_same(h, params['conv2_w'], params['conv2_b'])))
    seq = jnp.transpose(h, (0, 2, 1))            # (B, T, C)

    H = params['gru_whh_l0'].shape[1]

    def gru_layer(seq, wih, whh, bih, bhh):
        B = seq.shape[0]

        def cell(h, x_t):
            gi = x_t @ wih.T + bih
            gh = h @ whh.T + bhh
            r = jax.nn.sigmoid(gi[:, :H] + gh[:, :H])
            z = jax.nn.sigmoid(gi[:, H:2 * H] + gh[:, H:2 * H])
            n = jnp.tanh(gi[:, 2 * H:] + r * gh[:, 2 * H:])
            hn = (1.0 - z) * n + z * h
            return hn, hn

        h0 = jnp.zeros((B, H), jnp.float32)
        _, outs = jax.lax.scan(cell, h0, jnp.transpose(seq, (1, 0, 2)))
        return jnp.transpose(outs, (1, 0, 2))

    o1 = gru_layer(seq, params['gru_wih_l0'], params['gru_whh_l0'],
                   params['gru_bih_l0'], params['gru_bhh_l0'])
    o2 = gru_layer(o1, params['gru_wih_l1'], params['gru_whh_l1'],
                   params['gru_bih_l1'], params['gru_bhh_l1'])
    last = o2[:, -1, :]
    return last @ params['fc_w'].T + params['fc_b']


if __name__ == "__main__":
    key = jax.random.PRNGKey(0)
    ks = jax.random.split(key, 16)

    B, Cin, L = 2, 1, 32          # input sequence length 32 -> T = 8 after pools
    C, H, NC = 8, 32, 2           # cnn_filters, gru_hidden_dim, num_classes

    def p(k, shape, s=0.2):
        return (s * jax.random.normal(k, shape)).astype(jnp.float32)

    params = {
        'conv1_w': p(ks[0], (C, Cin, 3)), 'conv1_b': p(ks[1], (C,)),
        'conv2_w': p(ks[2], (C, C, 3)),   'conv2_b': p(ks[3], (C,)),
        'gru_wih_l0': p(ks[4], (3 * H, C)), 'gru_whh_l0': p(ks[5], (3 * H, H)),
        'gru_bih_l0': p(ks[6], (3 * H,)),   'gru_bhh_l0': p(ks[7], (3 * H,)),
        'gru_wih_l1': p(ks[8], (3 * H, H)), 'gru_whh_l1': p(ks[9], (3 * H, H)),
        'gru_bih_l1': p(ks[10], (3 * H,)),  'gru_bhh_l1': p(ks[11], (3 * H,)),
        'fc_w': p(ks[12], (NC, H)),         'fc_b': p(ks[13], (NC,)),
    }
    x = jax.random.normal(ks[14], (B, Cin, L), jnp.float32)

    out = jax.block_until_ready(cnn_gru_forward(x, params))
    ref = jax.block_until_ready(reference_forward(x, params))

    assert out.shape == (B, NC)
    # Tolerance loosened (bf16 MXU operands, f32 accumulation / f32 reference).
    np.testing.assert_allclose(np.asarray(out), np.asarray(ref),
                               rtol=2e-2, atol=2e-2)
    print("KERNEL_OK")
</pallas_src>

<mosaic_0001>
module attributes {stable_mosaic.version = 11 : i64} {
  func.func @kernel(%arg0: i32, %arg1: memref<64x1xf32, #tpu.memory_space<vmem>>, %arg2: memref<1x1152xf32, #tpu.memory_space<vmem>>, %arg3: memref<8x256xbf16, #tpu.memory_space<vmem>>, %arg4: memref<32x512xbf16, #tpu.memory_space<vmem>>, %arg5: memref<2x2xf32, #tpu.memory_space<vmem>>, %arg6: memref<64x8xf32, #tpu.memory_space<vmem>>, %arg7: memref<32x8xf32, #tpu.memory_space<vmem>>) attributes {dimension_semantics = [#tpu.dimension_semantics<parallel>], iteration_bounds = array<i64: 1>, scalar_prefetch = 0 : i64, scratch_operands = 2 : i64, tpu.core_type = #tpu.core_type<tc>, window_params = [{transform_indices = @transform_0, window_bounds = array<i64: 64, 1>}, {pipeline_mode = #tpu.pipeline_mode<synchronous>, transform_indices = @transform_1, window_bounds = array<i64: 1, 1152>}, {pipeline_mode = #tpu.pipeline_mode<synchronous>, transform_indices = @transform_2, window_bounds = array<i64: 8, 256>}, {pipeline_mode = #tpu.pipeline_mode<synchronous>, transform_indices = @transform_3, window_bounds = array<i64: 32, 512>}, {transform_indices = @transform_4, window_bounds = array<i64: 2, 2>}]} {
    %c0 = arith.constant 0 : index
    %c0_0 = arith.constant 0 : index
    %0 = vector.load %arg2[%c0, %c0_0] : memref<1x1152xf32, #tpu.memory_space<vmem>>, vector<1x24xf32>
    %c0_1 = arith.constant 0 : index
    %c128 = arith.constant 128 : index
    %1 = vector.load %arg2[%c0_1, %c128] : memref<1x1152xf32, #tpu.memory_space<vmem>>, vector<1x8xf32>
    %c0_2 = arith.constant 0 : index
    %c256 = arith.constant 256 : index
    %2 = vector.load %arg2[%c0_2, %c256] : memref<1x1152xf32, #tpu.memory_space<vmem>>, vector<1x8xf32>
    %c0_3 = arith.constant 0 : index
    %c384 = arith.constant 384 : index
    %3 = vector.load %arg2[%c0_3, %c384] : memref<1x1152xf32, #tpu.memory_space<vmem>>, vector<1x96xf32>
    %c0_4 = arith.constant 0 : index
    %c512 = arith.constant 512 : index
    %4 = vector.load %arg2[%c0_4, %c512] : memref<1x1152xf32, #tpu.memory_space<vmem>>, vector<1x192xf32>
    %c0_5 = arith.constant 0 : index
    %c768 = arith.constant 768 : index
    %5 = vector.load %arg2[%c0_5, %c768] : memref<1x1152xf32, #tpu.memory_space<vmem>>, vector<1x96xf32>
    %c0_6 = arith.constant 0 : index
    %c896 = arith.constant 896 : index
    %6 = vector.load %arg2[%c0_6, %c896] : memref<1x1152xf32, #tpu.memory_space<vmem>>, vector<1x96xf32>
    %c0_7 = arith.constant 0 : index
    %c1024 = arith.constant 1024 : index
    %7 = vector.load %arg2[%c0_7, %c1024] : memref<1x1152xf32, #tpu.memory_space<vmem>>, vector<1x2xf32>
    %c0_8 = arith.constant 0 : index
    %c0_9 = arith.constant 0 : index
    %8 = vector.load %arg3[%c0_8, %c0_9] : memref<8x256xbf16, #tpu.memory_space<vmem>>, vector<8x24xbf16>
    %c0_10 = arith.constant 0 : index
    %c128_11 = arith.constant 128 : index
    %9 = vector.load %arg3[%c0_10, %c128_11] : memref<8x256xbf16, #tpu.memory_space<vmem>>, vector<8x96xbf16>
    %c0_12 = arith.constant 0 : index
    %c0_13 = arith.constant 0 : index
    %10 = vector.load %arg4[%c0_12, %c0_13] : memref<32x512xbf16, #tpu.memory_space<vmem>>, vector<32x192xbf16>
    %c0_14 = arith.constant 0 : index
    %c256_15 = arith.constant 256 : index
    %11 = vector.load %arg4[%c0_14, %c256_15] : memref<32x512xbf16, #tpu.memory_space<vmem>>, vector<32x96xbf16>
    %c0_16 = arith.constant 0 : index
    %c384_17 = arith.constant 384 : index
    %12 = vector.load %arg4[%c0_16, %c384_17] : memref<32x512xbf16, #tpu.memory_space<vmem>>, vector<32x2xbf16>
    %c0_18 = arith.constant 0 : index
    %c0_19 = arith.constant 0 : index
    %13 = vector.load %arg1[%c0_18, %c0_19] : memref<64x1xf32, #tpu.memory_space<vmem>>, vector<64x1xf32>
    %14 = vector.broadcast %13 : vector<64x1xf32> to vector<64x24xf32>
    %15 = vector.broadcast %0 : vector<1x24xf32> to vector<64x24xf32>
    %16 = arith.mulf %14, %15 : vector<64x24xf32>
    %17 = vector.extract_strided_slice %16 {offsets = [0, 0], sizes = [64, 8], strides = [1, 1]} : vector<64x24xf32> to vector<64x8xf32>
    %18 = vector.extract_strided_slice %16 {offsets = [0, 8], sizes = [64, 8], strides = [1, 1]} : vector<64x24xf32> to vector<64x8xf32>
    %19 = vector.extract_strided_slice %16 {offsets = [0, 16], sizes = [64, 8], strides = [1, 1]} : vector<64x24xf32> to vector<64x8xf32>
    %20 = tpu.iota {dimensions = array<i32: 0>} : vector<64x8xi32>
    %c31_i32 = arith.constant 31 : i32
    %21 = vector.broadcast %c31_i32 : i32 to vector<64x8xi32>
    %22 = arith.andi %20, %21 : vector<64x8xi32>
    %c0_i32 = arith.constant 0 : i32
    %23 = vector.broadcast %c0_i32 : i32 to vector<64x8xi32>
    %24 = arith.cmpi eq, %22, %23 : vector<64x8xi32>
    %c1_i32 = arith.constant 1 : i32
    %25 = tpu.dynamic_rotate %17 by %c1_i32 dim 0 : vector<64x8xf32>, i32 -> vector<64x8xf32>
    %cst = arith.constant 0.000000e+00 : f32
    %26 = vector.broadcast %cst : f32 to vector<64x8xf32>
    %27 = arith.select %24, %26, %25 : vector<64x8xi1>, vector<64x8xf32>
    %c31_i32_20 = arith.constant 31 : i32
    %28 = vector.broadcast %c31_i32_20 : i32 to vector<64x8xi32>
    %29 = arith.cmpi eq, %22, %28 : vector<64x8xi32>
    %c63_i32 = arith.constant 63 : i32
    %30 = tpu.dynamic_rotate %19 by %c63_i32 dim 0 : vector<64x8xf32>, i32 -> vector<64x8xf32>
    %cst_21 = arith.constant 0.000000e+00 : f32
    %31 = vector.broadcast %cst_21 : f32 to vector<64x8xf32>
    %32 = arith.select %29, %31, %30 : vector<64x8xi1>, vector<64x8xf32>
    %33 = arith.addf %27, %18 : vector<64x8xf32>
    %34 = arith.addf %33, %32 : vector<64x8xf32>
    %35 = vector.broadcast %1 : vector<1x8xf32> to vector<64x8xf32>
    %36 = arith.addf %34, %35 : vector<64x8xf32>
    %cst_22 = arith.constant 0.000000e+00 : f32
    %37 = vector.broadcast %cst_22 : f32 to vector<64x8xf32>
    %38 = arith.maximumf %36, %37 : vector<64x8xf32>
    %c0_23 = arith.constant 0 : index
    %c0_24 = arith.constant 0 : index
    %39 = vector.load %arg6[%c0_23, %c0_24] : memref<64x8xf32, #tpu.memory_space<vmem>>, vector<64x8xf32>
    tpu.vector_store %arg6[%c0_23, %c0_24], %38 {strides = array<i32>} : memref<64x8xf32, #tpu.memory_space<vmem>>, vector<64x8xf32>,
    %c0_25 = arith.constant 0 : index
    %c0_26 = arith.constant 0 : index
    %40 = tpu.strided_load %arg6[%c0_25, %c0_26] {strides = array<i32: 2, 1>} : memref<64x8xf32, #tpu.memory_space<vmem>>, vector<32x8xf32>
    %c1 = arith.constant 1 : index
    %c0_27 = arith.constant 0 : index
    %41 = tpu.strided_load %arg6[%c1, %c0_27] {strides = array<i32: 2, 1>} : memref<64x8xf32, #tpu.memory_space<vmem>>, vector<32x8xf32>
    %42 = arith.maximumf %40, %41 : vector<32x8xf32>
    %43 = arith.truncf %42 : vector<32x8xf32> to vector<32x8xbf16>
    %cst_28 = arith.constant dense<0.000000e+00> : vector<32x24xf32>
    %44 = tpu.matmul %43, %8, %cst_28 {dimension_numbers = #tpu.dot_dimension_numbers<[1], [0], [0], [1], [0, 0, 1, 1], [], []>} : vector<32x8xbf16>, vector<8x24xbf16>, vector<32x24xf32> -> vector<32x24xf32>
    %45 = vector.extract_strided_slice %44 {offsets = [0, 0], sizes = [32, 8], strides = [1, 1]} : vector<32x24xf32> to vector<32x8xf32>
    %46 = vector.extract_strided_slice %44 {offsets = [0, 8], sizes = [32, 8], strides = [1, 1]} : vector<32x24xf32> to vector<32x8xf32>
    %47 = vector.extract_strided_slice %44 {offsets = [0, 16], sizes = [32, 8], strides = [1, 1]} : vector<32x24xf32> to vector<32x8xf32>
    %48 = tpu.iota {dimensions = array<i32: 0>} : vector<32x8xi32>
    %c15_i32 = arith.constant 15 : i32
    %49 = vector.broadcast %c15_i32 : i32 to vector<32x8xi32>
    %50 = arith.andi %48, %49 : vector<32x8xi32>
    %c0_i32_29 = arith.constant 0 : i32
    %51 = vector.broadcast %c0_i32_29 : i32 to vector<32x8xi32>
    %52 = arith.cmpi eq, %50, %51 : vector<32x8xi32>
    %c1_i32_30 = arith.constant 1 : i32
    %53 = tpu.dynamic_rotate %45 by %c1_i32_30 dim 0 : vector<32x8xf32>, i32 -> vector<32x8xf32>
    %cst_31 = arith.constant 0.000000e+00 : f32
    %54 = vector.broadcast %cst_31 : f32 to vector<32x8xf32>
    %55 = arith.select %52, %54, %53 : vector<32x8xi1>, vector<32x8xf32>
    %c15_i32_32 = arith.constant 15 : i32
    %56 = vector.broadcast %c15_i32_32 : i32 to vector<32x8xi32>
    %57 = arith.cmpi eq, %50, %56 : vector<32x8xi32>
    %c31_i32_33 = arith.constant 31 : i32
    %58 = tpu.dynamic_rotate %47 by %c31_i32_33 dim 0 : vector<32x8xf32>, i32 -> vector<32x8xf32>
    %cst_34 = arith.constant 0.000000e+00 : f32
    %59 = vector.broadcast %cst_34 : f32 to vector<32x8xf32>
    %60 = arith.select %57, %59, %58 : vector<32x8xi1>, vector<32x8xf32>
    %61 = arith.addf %55, %46 : vector<32x8xf32>
    %62 = arith.addf %61, %60 : vector<32x8xf32>
    %63 = vector.broadcast %2 : vector<1x8xf32> to vector<32x8xf32>
    %64 = arith.addf %62, %63 : vector<32x8xf32>
    %cst_35 = arith.constant 0.000000e+00 : f32
    %65 = vector.broadcast %cst_35 : f32 to vector<32x8xf32>
    %66 = arith.maximumf %64, %65 : vector<32x8xf32>
    %c0_36 = arith.constant 0 : index
    %c0_37 = arith.constant 0 : index
    %67 = vector.load %arg7[%c0_36, %c0_37] : memref<32x8xf32, #tpu.memory_space<vmem>>, vector<32x8xf32>
    tpu.vector_store %arg7[%c0_36, %c0_37], %66 {strides = array<i32>} : memref<32x8xf32, #tpu.memory_space<vmem>>, vector<32x8xf32>,
    %c0_38 = arith.constant 0 : index
    %c0_39 = arith.constant 0 : index
    %68 = tpu.strided_load %arg7[%c0_38, %c0_39] {strides = array<i32: 16, 1>} : memref<32x8xf32, #tpu.memory_space<vmem>>, vector<2x8xf32>
    %c1_40 = arith.constant 1 : index
    %c0_41 = arith.constant 0 : index
    %69 = tpu.strided_load %arg7[%c1_40, %c0_41] {strides = array<i32: 16, 1>} : memref<32x8xf32, #tpu.memory_space<vmem>>, vector<2x8xf32>
    %70 = arith.maximumf %68, %69 : vector<2x8xf32>
    %c2 = arith.constant 2 : index
    %c0_42 = arith.constant 0 : index
    %71 = tpu.strided_load %arg7[%c2, %c0_42] {strides = array<i32: 16, 1>} : memref<32x8xf32, #tpu.memory_space<vmem>>, vector<2x8xf32>
    %c3 = arith.constant 3 : index
    %c0_43 = arith.constant 0 : index
    %72 = tpu.strided_load %arg7[%c3, %c0_43] {strides = array<i32: 16, 1>} : memref<32x8xf32, #tpu.memory_space<vmem>>, vector<2x8xf32>
    %73 = arith.maximumf %71, %72 : vector<2x8xf32>
    %c4 = arith.constant 4 : index
    %c0_44 = arith.constant 0 : index
    %74 = tpu.strided_load %arg7[%c4, %c0_44] {strides = array<i32: 16, 1>} : memref<32x8xf32, #tpu.memory_space<vmem>>, vector<2x8xf32>
    %c5 = arith.constant 5 : index
    %c0_45 = arith.constant 0 : index
    %75 = tpu.strided_load %arg7[%c5, %c0_45] {strides = array<i32: 16, 1>} : memref<32x8xf32, #tpu.memory_space<vmem>>, vector<2x8xf32>
    %76 = arith.maximumf %74, %75 : vector<2x8xf32>
    %c6 = arith.constant 6 : index
    %c0_46 = arith.constant 0 : index
    %77 = tpu.strided_load %arg7[%c6, %c0_46] {strides = array<i32: 16, 1>} : memref<32x8xf32, #tpu.memory_space<vmem>>, vector<2x8xf32>
    %c7 = arith.constant 7 : index
    %c0_47 = arith.constant 0 : index
    %78 = tpu.strided_load %arg7[%c7, %c0_47] {strides = array<i32: 16, 1>} : memref<32x8xf32, #tpu.memory_space<vmem>>, vector<2x8xf32>
    %79 = arith.maximumf %77, %78 : vector<2x8xf32>
    %c8 = arith.constant 8 : index
    %c0_48 = arith.constant 0 : index
    %80 = tpu.strided_load %arg7[%c8, %c0_48] {strides = array<i32: 16, 1>} : memref<32x8xf32, #tpu.memory_space<vmem>>, vector<2x8xf32>
    %c9 = arith.constant 9 : index
    %c0_49 = arith.constant 0 : index
    %81 = tpu.strided_load %arg7[%c9, %c0_49] {strides = array<i32: 16, 1>} : memref<32x8xf32, #tpu.memory_space<vmem>>, vector<2x8xf32>
    %82 = arith.maximumf %80, %81 : vector<2x8xf32>
    %c10 = arith.constant 10 : index
    %c0_50 = arith.constant 0 : index
    %83 = tpu.strided_load %arg7[%c10, %c0_50] {strides = array<i32: 16, 1>} : memref<32x8xf32, #tpu.memory_space<vmem>>, vector<2x8xf32>
    %c11 = arith.constant 11 : index
    %c0_51 = arith.constant 0 : index
    %84 = tpu.strided_load %arg7[%c11, %c0_51] {strides = array<i32: 16, 1>} : memref<32x8xf32, #tpu.memory_space<vmem>>, vector<2x8xf32>
    %85 = arith.maximumf %83, %84 : vector<2x8xf32>
    %c12 = arith.constant 12 : index
    %c0_52 = arith.constant 0 : index
    %86 = tpu.strided_load %arg7[%c12, %c0_52] {strides = array<i32: 16, 1>} : memref<32x8xf32, #tpu.memory_space<vmem>>, vector<2x8xf32>
    %c13 = arith.constant 13 : index
    %c0_53 = arith.constant 0 : index
    %87 = tpu.strided_load %arg7[%c13, %c0_53] {strides = array<i32: 16, 1>} : memref<32x8xf32, #tpu.memory_space<vmem>>, vector<2x8xf32>
    %88 = arith.maximumf %86, %87 : vector<2x8xf32>
    %c14 = arith.constant 14 : index
    %c0_54 = arith.constant 0 : index
    %89 = tpu.strided_load %arg7[%c14, %c0_54] {strides = array<i32: 16, 1>} : memref<32x8xf32, #tpu.memory_space<vmem>>, vector<2x8xf32>
    %c15 = arith.constant 15 : index
    %c0_55 = arith.constant 0 : index
    %90 = tpu.strided_load %arg7[%c15, %c0_55] {strides = array<i32: 16, 1>} : memref<32x8xf32, #tpu.memory_space<vmem>>, vector<2x8xf32>
    %91 = arith.maximumf %89, %90 : vector<2x8xf32>
    %92 = tpu.concatenate %70, %73, %76, %79, %82, %85, %88, %91 in 0 : vector<2x8xf32>, vector<2x8xf32>, vector<2x8xf32>, vector<2x8xf32>, vector<2x8xf32>, vector<2x8xf32>, vector<2x8xf32>, vector<2x8xf32> -> vector<16x8xf32>
    %93 = arith.truncf %92 : vector<16x8xf32> to vector<16x8xbf16>
    %cst_56 = arith.constant dense<0.000000e+00> : vector<16x96xf32>
    %94 = tpu.matmul %93, %9, %cst_56 {dimension_numbers = #tpu.dot_dimension_numbers<[1], [0], [0], [1], [0, 0, 1, 1], [], []>} : vector<16x8xbf16>, vector<8x96xbf16>, vector<16x96xf32> -> vector<16x96xf32>
    %95 = vector.broadcast %3 : vector<1x96xf32> to vector<16x96xf32>
    %96 = arith.addf %94, %95 : vector<16x96xf32>
    %cst_57 = arith.constant 0.000000e+00 : f32
    %97 = vector.broadcast %cst_57 : f32 to vector<2x32xf32>
    %cst_58 = arith.constant 0.000000e+00 : f32
    %98 = vector.broadcast %cst_58 : f32 to vector<2x32xf32>
    %cst_59 = arith.constant 0.000000e+00 : f32
    %99 = vector.broadcast %cst_59 : f32 to vector<2x96xf32>
    %100 = vector.broadcast %5 : vector<1x96xf32> to vector<2x96xf32>
    %101 = arith.addf %99, %100 : vector<2x96xf32>
    %cst_60 = arith.constant 0.000000e+00 : f32
    %102 = vector.broadcast %cst_60 : f32 to vector<2x96xf32>
    %103 = vector.broadcast %6 : vector<1x96xf32> to vector<2x96xf32>
    %104 = arith.addf %102, %103 : vector<2x96xf32>
    %105 = vector.extract_strided_slice %96 {offsets = [0, 0], sizes = [2, 96], strides = [1, 1]} : vector<16x96xf32> to vector<2x96xf32>
    %106 = vector.extract_strided_slice %105 {offsets = [0, 0], sizes = [2, 32], strides = [1, 1]} : vector<2x96xf32> to vector<2x32xf32>
    %107 = vector.extract_strided_slice %101 {offsets = [0, 0], sizes = [2, 32], strides = [1, 1]} : vector<2x96xf32> to vector<2x32xf32>
    %108 = arith.addf %106, %107 : vector<2x32xf32>
    %109 = arith.negf %108 : vector<2x32xf32>
    %110 = math.exp %109 : vector<2x32xf32>
    %cst_61 = arith.constant 1.000000e+00 : f32
    %111 = vector.broadcast %cst_61 : f32 to vector<2x32xf32>
    %112 = arith.addf %111, %110 : vector<2x32xf32>
    %113 = arith.divf %111, %112 : vector<2x32xf32>
    %114 = vector.extract_strided_slice %105 {offsets = [0, 32], sizes = [2, 32], strides = [1, 1]} : vector<2x96xf32> to vector<2x32xf32>
    %115 = vector.extract_strided_slice %101 {offsets = [0, 32], sizes = [2, 32], strides = [1, 1]} : vector<2x96xf32> to vector<2x32xf32>
    %116 = arith.addf %114, %115 : vector<2x32xf32>
    %117 = arith.negf %116 : vector<2x32xf32>
    %118 = math.exp %117 : vector<2x32xf32>
    %cst_62 = arith.constant 1.000000e+00 : f32
    %119 = vector.broadcast %cst_62 : f32 to vector<2x32xf32>
    %120 = arith.addf %119, %118 : vector<2x32xf32>
    %121 = arith.divf %119, %120 : vector<2x32xf32>
    %122 = vector.extract_strided_slice %105 {offsets = [0, 64], sizes = [2, 32], strides = [1, 1]} : vector<2x96xf32> to vector<2x32xf32>
    %123 = vector.extract_strided_slice %101 {offsets = [0, 64], sizes = [2, 32], strides = [1, 1]} : vector<2x96xf32> to vector<2x32xf32>
    %124 = arith.mulf %113, %123 : vector<2x32xf32>
    %125 = arith.addf %122, %124 : vector<2x32xf32>
    %126 = math.tanh %125 : vector<2x32xf32>
    %127 = arith.subf %97, %126 : vector<2x32xf32>
    %128 = arith.mulf %121, %127 : vector<2x32xf32>
    %129 = arith.addf %126, %128 : vector<2x32xf32>
    %130 = arith.truncf %129 : vector<2x32xf32> to vector<2x32xbf16>
    %cst_63 = arith.constant dense<0.000000e+00> : vector<2x192xf32>
    %131 = tpu.matmul %130, %10, %cst_63 {dimension_numbers = #tpu.dot_dimension_numbers<[1], [0], [0], [1], [0, 0, 1, 1], [], []>} : vector<2x32xbf16>, vector<32x192xbf16>, vector<2x192xf32> -> vector<2x192xf32>
    %132 = vector.broadcast %4 : vector<1x192xf32> to vector<2x192xf32>
    %133 = arith.addf %131, %132 : vector<2x192xf32>
    %134 = vector.extract_strided_slice %133 {offsets = [0, 0], sizes = [2, 96], strides = [1, 1]} : vector<2x192xf32> to vector<2x96xf32>
    %135 = vector.extract_strided_slice %133 {offsets = [0, 96], sizes = [2, 96], strides = [1, 1]} : vector<2x192xf32> to vector<2x96xf32>
    %136 = vector.extract_strided_slice %134 {offsets = [0, 0], sizes = [2, 32], strides = [1, 1]} : vector<2x96xf32> to vector<2x32xf32>
    %137 = vector.extract_strided_slice %104 {offsets = [0, 0], sizes = [2, 32], strides = [1, 1]} : vector<2x96xf32> to vector<2x32xf32>
    %138 = arith.addf %136, %137 : vector<2x32xf32>
    %139 = arith.negf %138 : vector<2x32xf32>
    %140 = math.exp %139 : vector<2x32xf32>
    %cst_64 = arith.constant 1.000000e+00 : f32
    %141 = vector.broadcast %cst_64 : f32 to vector<2x32xf32>
    %142 = arith.addf %141, %140 : vector<2x32xf32>
    %143 = arith.divf %141, %142 : vector<2x32xf32>
    %144 = vector.extract_strided_slice %134 {offsets = [0, 32], sizes = [2, 32], strides = [1, 1]} : vector<2x96xf32> to vector<2x32xf32>
    %145 = vector.extract_strided_slice %104 {offsets = [0, 32], sizes = [2, 32], strides = [1, 1]} : vector<2x96xf32> to vector<2x32xf32>
    %146 = arith.addf %144, %145 : vector<2x32xf32>
    %147 = arith.negf %146 : vector<2x32xf32>
    %148 = math.exp %147 : vector<2x32xf32>
    %cst_65 = arith.constant 1.000000e+00 : f32
    %149 = vector.broadcast %cst_65 : f32 to vector<2x32xf32>
    %150 = arith.addf %149, %148 : vector<2x32xf32>
    %151 = arith.divf %149, %150 : vector<2x32xf32>
    %152 = vector.extract_strided_slice %134 {offsets = [0, 64], sizes = [2, 32], strides = [1, 1]} : vector<2x96xf32> to vector<2x32xf32>
    %153 = vector.extract_strided_slice %104 {offsets = [0, 64], sizes = [2, 32], strides = [1, 1]} : vector<2x96xf32> to vector<2x32xf32>
    %154 = arith.mulf %143, %153 : vector<2x32xf32>
    %155 = arith.addf %152, %154 : vector<2x32xf32>
    %156 = math.tanh %155 : vector<2x32xf32>
    %157 = arith.subf %98, %156 : vector<2x32xf32>
    %158 = arith.mulf %151, %157 : vector<2x32xf32>
    %159 = arith.addf %156, %158 : vector<2x32xf32>
    %160 = arith.truncf %159 : vector<2x32xf32> to vector<2x32xbf16>
    %cst_66 = arith.constant dense<0.000000e+00> : vector<2x96xf32>
    %161 = tpu.matmul %160, %11, %cst_66 {dimension_numbers = #tpu.dot_dimension_numbers<[1], [0], [0], [1], [0, 0, 1, 1], [], []>} : vector<2x32xbf16>, vector<32x96xbf16>, vector<2x96xf32> -> vector<2x96xf32>
    %162 = vector.broadcast %6 : vector<1x96xf32> to vector<2x96xf32>
    %163 = arith.addf %161, %162 : vector<2x96xf32>
    %164 = vector.extract_strided_slice %96 {offsets = [2, 0], sizes = [2, 96], strides = [1, 1]} : vector<16x96xf32> to vector<2x96xf32>
    %165 = vector.extract_strided_slice %164 {offsets = [0, 0], sizes = [2, 32], strides = [1, 1]} : vector<2x96xf32> to vector<2x32xf32>
    %166 = vector.extract_strided_slice %135 {offsets = [0, 0], sizes = [2, 32], strides = [1, 1]} : vector<2x96xf32> to vector<2x32xf32>
    %167 = arith.addf %165, %166 : vector<2x32xf32>
    %168 = arith.negf %167 : vector<2x32xf32>
    %169 = math.exp %168 : vector<2x32xf32>
    %cst_67 = arith.constant 1.000000e+00 : f32
    %170 = vector.broadcast %cst_67 : f32 to vector<2x32xf32>
    %171 = arith.addf %170, %169 : vector<2x32xf32>
    %172 = arith.divf %170, %171 : vector<2x32xf32>
    %173 = vector.extract_strided_slice %164 {offsets = [0, 32], sizes = [2, 32], strides = [1, 1]} : vector<2x96xf32> to vector<2x32xf32>
    %174 = vector.extract_strided_slice %135 {offsets = [0, 32], sizes = [2, 32], strides = [1, 1]} : vector<2x96xf32> to vector<2x32xf32>
    %175 = arith.addf %173, %174 : vector<2x32xf32>
    %176 = arith.negf %175 : vector<2x32xf32>
    %177 = math.exp %176 : vector<2x32xf32>
    %cst_68 = arith.constant 1.000000e+00 : f32
    %178 = vector.broadcast %cst_68 : f32 to vector<2x32xf32>
    %179 = arith.addf %178, %177 : vector<2x32xf32>
    %180 = arith.divf %178, %179 : vector<2x32xf32>
    %181 = vector.extract_strided_slice %164 {offsets = [0, 64], sizes = [2, 32], strides = [1, 1]} : vector<2x96xf32> to vector<2x32xf32>
    %182 = vector.extract_strided_slice %135 {offsets = [0, 64], sizes = [2, 32], strides = [1, 1]} : vector<2x96xf32> to vector<2x32xf32>
    %183 = arith.mulf %172, %182 : vector<2x32xf32>
    %184 = arith.addf %181, %183 : vector<2x32xf32>
    %185 = math.tanh %184 : vector<2x32xf32>
    %186 = arith.subf %129, %185 : vector<2x32xf32>
    %187 = arith.mulf %180, %186 : vector<2x32xf32>
    %188 = arith.addf %185, %187 : vector<2x32xf32>
    %189 = arith.truncf %188 : vector<2x32xf32> to vector<2x32xbf16>
    %cst_69 = arith.constant dense<0.000000e+00> : vector<2x192xf32>
    %190 = tpu.matmul %189, %10, %cst_69 {dimension_numbers = #tpu.dot_dimension_numbers<[1], [0], [0], [1], [0, 0, 1, 1], [], []>} : vector<2x32xbf16>, vector<32x192xbf16>, vector<2x192xf32> -> vector<2x192xf32>
    %191 = vector.broadcast %4 : vector<1x192xf32> to vector<2x192xf32>
    %192 = arith.addf %190, %191 : vector<2x192xf32>
    %193 = vector.extract_strided_slice %192 {offsets = [0, 0], sizes = [2, 96], strides = [1, 1]} : vector<2x192xf32> to vector<2x96xf32>
    %194 = vector.extract_strided_slice %192 {offsets = [0, 96], sizes = [2, 96], strides = [1, 1]} : vector<2x192xf32> to vector<2x96xf32>
    %195 = vector.extract_strided_slice %193 {offsets = [0, 0], sizes = [2, 32], strides = [1, 1]} : vector<2x96xf32> to vector<2x32xf32>
    %196 = vector.extract_strided_slice %163 {offsets = [0, 0], sizes = [2, 32], strides = [1, 1]} : vector<2x96xf32> to vector<2x32xf32>
    %197 = arith.addf %195, %196 : vector<2x32xf32>
    %198 = arith.negf %197 : vector<2x32xf32>
    %199 = math.exp %198 : vector<2x32xf32>
    %cst_70 = arith.constant 1.000000e+00 : f32
    %200 = vector.broadcast %cst_70 : f32 to vector<2x32xf32>
    %201 = arith.addf %200, %199 : vector<2x32xf32>
    %202 = arith.divf %200, %201 : vector<2x32xf32>
    %203 = vector.extract_strided_slice %193 {offsets = [0, 32], sizes = [2, 32], strides = [1, 1]} : vector<2x96xf32> to vector<2x32xf32>
    %204 = vector.extract_strided_slice %163 {offsets = [0, 32], sizes = [2, 32], strides = [1, 1]} : vector<2x96xf32> to vector<2x32xf32>
    %205 = arith.addf %203, %204 : vector<2x32xf32>
    %206 = arith.negf %205 : vector<2x32xf32>
    %207 = math.exp %206 : vector<2x32xf32>
    %cst_71 = arith.constant 1.000000e+00 : f32
    %208 = vector.broadcast %cst_71 : f32 to vector<2x32xf32>
    %209 = arith.addf %208, %207 : vector<2x32xf32>
    %210 = arith.divf %208, %209 : vector<2x32xf32>
    %211 = vector.extract_strided_slice %193 {offsets = [0, 64], sizes = [2, 32], strides = [1, 1]} : vector<2x96xf32> to vector<2x32xf32>
    %212 = vector.extract_strided_slice %163 {offsets = [0, 64], sizes = [2, 32], strides = [1, 1]} : vector<2x96xf32> to vector<2x32xf32>
    %213 = arith.mulf %202, %212 : vector<2x32xf32>
    %214 = arith.addf %211, %213 : vector<2x32xf32>
    %215 = math.tanh %214 : vector<2x32xf32>
    %216 = arith.subf %159, %215 : vector<2x32xf32>
    %217 = arith.mulf %210, %216 : vector<2x32xf32>
    %218 = arith.addf %215, %217 : vector<2x32xf32>
    %219 = arith.truncf %218 : vector<2x32xf32> to vector<2x32xbf16>
    %cst_72 = arith.constant dense<0.000000e+00> : vector<2x96xf32>
    %220 = tpu.matmul %219, %11, %cst_72 {dimension_numbers = #tpu.dot_dimension_numbers<[1], [0], [0], [1], [0, 0, 1, 1], [], []>} : vector<2x32xbf16>, vector<32x96xbf16>, vector<2x96xf32> -> vector<2x96xf32>
    %221 = vector.broadcast %6 : vector<1x96xf32> to vector<2x96xf32>
    %222 = arith.addf %220, %221 : vector<2x96xf32>
    %223 = vector.extract_strided_slice %96 {offsets = [4, 0], sizes = [2, 96], strides = [1, 1]} : vector<16x96xf32> to vector<2x96xf32>
    %224 = vector.extract_strided_slice %223 {offsets = [0, 0], sizes = [2, 32], strides = [1, 1]} : vector<2x96xf32> to vector<2x32xf32>
    %225 = vector.extract_strided_slice %194 {offsets = [0, 0], sizes = [2, 32], strides = [1, 1]} : vector<2x96xf32> to vector<2x32xf32>
    %226 = arith.addf %224, %225 : vector<2x32xf32>
    %227 = arith.negf %226 : vector<2x32xf32>
    %228 = math.exp %227 : vector<2x32xf32>
    %cst_73 = arith.constant 1.000000e+00 : f32
    %229 = vector.broadcast %cst_73 : f32 to vector<2x32xf32>
    %230 = arith.addf %229, %228 : vector<2x32xf32>
    %231 = arith.divf %229, %230 : vector<2x32xf32>
    %232 = vector.extract_strided_slice %223 {offsets = [0, 32], sizes = [2, 32], strides = [1, 1]} : vector<2x96xf32> to vector<2x32xf32>
    %233 = vector.extract_strided_slice %194 {offsets = [0, 32], sizes = [2, 32], strides = [1, 1]} : vector<2x96xf32> to vector<2x32xf32>
    %234 = arith.addf %232, %233 : vector<2x32xf32>
    %235 = arith.negf %234 : vector<2x32xf32>
    %236 = math.exp %235 : vector<2x32xf32>
    %cst_74 = arith.constant 1.000000e+00 : f32
    %237 = vector.broadcast %cst_74 : f32 to vector<2x32xf32>
    %238 = arith.addf %237, %236 : vector<2x32xf32>
    %239 = arith.divf %237, %238 : vector<2x32xf32>
    %240 = vector.extract_strided_slice %223 {offsets = [0, 64], sizes = [2, 32], strides = [1, 1]} : vector<2x96xf32> to vector<2x32xf32>
    %241 = vector.extract_strided_slice %194 {offsets = [0, 64], sizes = [2, 32], strides = [1, 1]} : vector<2x96xf32> to vector<2x32xf32>
    %242 = arith.mulf %231, %241 : vector<2x32xf32>
    %243 = arith.addf %240, %242 : vector<2x32xf32>
    %244 = math.tanh %243 : vector<2x32xf32>
    %245 = arith.subf %188, %244 : vector<2x32xf32>
    %246 = arith.mulf %239, %245 : vector<2x32xf32>
    %247 = arith.addf %244, %246 : vector<2x32xf32>
    %248 = arith.truncf %247 : vector<2x32xf32> to vector<2x32xbf16>
    %cst_75 = arith.constant dense<0.000000e+00> : vector<2x192xf32>
    %249 = tpu.matmul %248, %10, %cst_75 {dimension_numbers = #tpu.dot_dimension_numbers<[1], [0], [0], [1], [0, 0, 1, 1], [], []>} : vector<2x32xbf16>, vector<32x192xbf16>, vector<2x192xf32> -> vector<2x192xf32>
    %250 = vector.broadcast %4 : vector<1x192xf32> to vector<2x192xf32>
    %251 = arith.addf %249, %250 : vector<2x192xf32>
    %252 = vector.extract_strided_slice %251 {offsets = [0, 0], sizes = [2, 96], strides = [1, 1]} : vector<2x192xf32> to vector<2x96xf32>
    %253 = vector.extract_strided_slice %251 {offsets = [0, 96], sizes = [2, 96], strides = [1, 1]} : vector<2x192xf32> to vector<2x96xf32>
    %254 = vector.extract_strided_slice %252 {offsets = [0, 0], sizes = [2, 32], strides = [1, 1]} : vector<2x96xf32> to vector<2x32xf32>
    %255 = vector.extract_strided_slice %222 {offsets = [0, 0], sizes = [2, 32], strides = [1, 1]} : vector<2x96xf32> to vector<2x32xf32>
    %256 = arith.addf %254, %255 : vector<2x32xf32>
    %257 = arith.negf %256 : vector<2x32xf32>
    %258 = math.exp %257 : vector<2x32xf32>
    %cst_76 = arith.constant 1.000000e+00 : f32
    %259 = vector.broadcast %cst_76 : f32 to vector<2x32xf32>
    %260 = arith.addf %259, %258 : vector<2x32xf32>
    %261 = arith.divf %259, %260 : vector<2x32xf32>
    %262 = vector.extract_strided_slice %252 {offsets = [0, 32], sizes = [2, 32], strides = [1, 1]} : vector<2x96xf32> to vector<2x32xf32>
    %263 = vector.extract_strided_slice %222 {offsets = [0, 32], sizes = [2, 32], strides = [1, 1]} : vector<2x96xf32> to vector<2x32xf32>
    %264 = arith.addf %262, %263 : vector<2x32xf32>
    %265 = arith.negf %264 : vector<2x32xf32>
    %266 = math.exp %265 : vector<2x32xf32>
    %cst_77 = arith.constant 1.000000e+00 : f32
    %267 = vector.broadcast %cst_77 : f32 to vector<2x32xf32>
    %268 = arith.addf %267, %266 : vector<2x32xf32>
    %269 = arith.divf %267, %268 : vector<2x32xf32>
    %270 = vector.extract_strided_slice %252 {offsets = [0, 64], sizes = [2, 32], strides = [1, 1]} : vector<2x96xf32> to vector<2x32xf32>
    %271 = vector.extract_strided_slice %222 {offsets = [0, 64], sizes = [2, 32], strides = [1, 1]} : vector<2x96xf32> to vector<2x32xf32>
    %272 = arith.mulf %261, %271 : vector<2x32xf32>
    %273 = arith.addf %270, %272 : vector<2x32xf32>
    %274 = math.tanh %273 : vector<2x32xf32>
    %275 = arith.subf %218, %274 : vector<2x32xf32>
    %276 = arith.mulf %269, %275 : vector<2x32xf32>
    %277 = arith.addf %274, %276 : vector<2x32xf32>
    %278 = arith.truncf %277 : vector<2x32xf32> to vector<2x32xbf16>
    %cst_78 = arith.constant dense<0.000000e+00> : vector<2x96xf32>
    %279 = tpu.matmul %278, %11, %cst_78 {dimension_numbers = #tpu.dot_dimension_numbers<[1], [0], [0], [1], [0, 0, 1, 1], [], []>} : vector<2x32xbf16>, vector<32x96xbf16>, vector<2x96xf32> -> vector<2x96xf32>
    %280 = vector.broadcast %6 : vector<1x96xf32> to vector<2x96xf32>
    %281 = arith.addf %279, %280 : vector<2x96xf32>
    %282 = vector.extract_strided_slice %96 {offsets = [6, 0], sizes = [2, 96], strides = [1, 1]} : vector<16x96xf32> to vector<2x96xf32>
    %283 = vector.extract_strided_slice %282 {offsets = [0, 0], sizes = [2, 32], strides = [1, 1]} : vector<2x96xf32> to vector<2x32xf32>
    %284 = vector.extract_strided_slice %253 {offsets = [0, 0], sizes = [2, 32], strides = [1, 1]} : vector<2x96xf32> to vector<2x32xf32>
    %285 = arith.addf %283, %284 : vector<2x32xf32>
    %286 = arith.negf %285 : vector<2x32xf32>
    %287 = math.exp %286 : vector<2x32xf32>
    %cst_79 = arith.constant 1.000000e+00 : f32
    %288 = vector.broadcast %cst_79 : f32 to vector<2x32xf32>
    %289 = arith.addf %288, %287 : vector<2x32xf32>
    %290 = arith.divf %288, %289 : vector<2x32xf32>
    %291 = vector.extract_strided_slice %282 {offsets = [0, 32], sizes = [2, 32], strides = [1, 1]} : vector<2x96xf32> to vector<2x32xf32>
    %292 = vector.extract_strided_slice %253 {offsets = [0, 32], sizes = [2, 32], strides = [1, 1]} : vector<2x96xf32> to vector<2x32xf32>
    %293 = arith.addf %291, %292 : vector<2x32xf32>
    %294 = arith.negf %293 : vector<2x32xf32>
    %295 = math.exp %294 : vector<2x32xf32>
    %cst_80 = arith.constant 1.000000e+00 : f32
    %296 = vector.broadcast %cst_80 : f32 to vector<2x32xf32>
    %297 = arith.addf %296, %295 : vector<2x32xf32>
    %298 = arith.divf %296, %297 : vector<2x32xf32>
    %299 = vector.extract_strided_slice %282 {offsets = [0, 64], sizes = [2, 32], strides = [1, 1]} : vector<2x96xf32> to vector<2x32xf32>
    %300 = vector.extract_strided_slice %253 {offsets = [0, 64], sizes = [2, 32], strides = [1, 1]} : vector<2x96xf32> to vector<2x32xf32>
    %301 = arith.mulf %290, %300 : vector<2x32xf32>
    %302 = arith.addf %299, %301 : vector<2x32xf32>
    %303 = math.tanh %302 : vector<2x32xf32>
    %304 = arith.subf %247, %303 : vector<2x32xf32>
    %305 = arith.mulf %298, %304 : vector<2x32xf32>
    %306 = arith.addf %303, %305 : vector<2x32xf32>
    %307 = arith.truncf %306 : vector<2x32xf32> to vector<2x32xbf16>
    %cst_81 = arith.constant dense<0.000000e+00> : vector<2x192xf32>
    %308 = tpu.matmul %307, %10, %cst_81 {dimension_numbers = #tpu.dot_dimension_numbers<[1], [0], [0], [1], [0, 0, 1, 1], [], []>} : vector<2x32xbf16>, vector<32x192xbf16>, vector<2x192xf32> -> vector<2x192xf32>
    %309 = vector.broadcast %4 : vector<1x192xf32> to vector<2x192xf32>
    %310 = arith.addf %308, %309 : vector<2x192xf32>
    %311 = vector.extract_strided_slice %310 {offsets = [0, 0], sizes = [2, 96], strides = [1, 1]} : vector<2x192xf32> to vector<2x96xf32>
    %312 = vector.extract_strided_slice %310 {offsets = [0, 96], sizes = [2, 96], strides = [1, 1]} : vector<2x192xf32> to vector<2x96xf32>
    %313 = vector.extract_strided_slice %311 {offsets = [0, 0], sizes = [2, 32], strides = [1, 1]} : vector<2x96xf32> to vector<2x32xf32>
    %314 = vector.extract_strided_slice %281 {offsets = [0, 0], sizes = [2, 32], strides = [1, 1]} : vector<2x96xf32> to vector<2x32xf32>
    %315 = arith.addf %313, %314 : vector<2x32xf32>
    %316 = arith.negf %315 : vector<2x32xf32>
    %317 = math.exp %316 : vector<2x32xf32>
    %cst_82 = arith.constant 1.000000e+00 : f32
    %318 = vector.broadcast %cst_82 : f32 to vector<2x32xf32>
    %319 = arith.addf %318, %317 : vector<2x32xf32>
    %320 = arith.divf %318, %319 : vector<2x32xf32>
    %321 = vector.extract_strided_slice %311 {offsets = [0, 32], sizes = [2, 32], strides = [1, 1]} : vector<2x96xf32> to vector<2x32xf32>
    %322 = vector.extract_strided_slice %281 {offsets = [0, 32], sizes = [2, 32], strides = [1, 1]} : vector<2x96xf32> to vector<2x32xf32>
    %323 = arith.addf %321, %322 : vector<2x32xf32>
    %324 = arith.negf %323 : vector<2x32xf32>
    %325 = math.exp %324 : vector<2x32xf32>
    %cst_83 = arith.constant 1.000000e+00 : f32
    %326 = vector.broadcast %cst_83 : f32 to vector<2x32xf32>
    %327 = arith.addf %326, %325 : vector<2x32xf32>
    %328 = arith.divf %326, %327 : vector<2x32xf32>
    %329 = vector.extract_strided_slice %311 {offsets = [0, 64], sizes = [2, 32], strides = [1, 1]} : vector<2x96xf32> to vector<2x32xf32>
    %330 = vector.extract_strided_slice %281 {offsets = [0, 64], sizes = [2, 32], strides = [1, 1]} : vector<2x96xf32> to vector<2x32xf32>
    %331 = arith.mulf %320, %330 : vector<2x32xf32>
    %332 = arith.addf %329, %331 : vector<2x32xf32>
    %333 = math.tanh %332 : vector<2x32xf32>
    %334 = arith.subf %277, %333 : vector<2x32xf32>
    %335 = arith.mulf %328, %334 : vector<2x32xf32>
    %336 = arith.addf %333, %335 : vector<2x32xf32>
    %337 = arith.truncf %336 : vector<2x32xf32> to vector<2x32xbf16>
    %cst_84 = arith.constant dense<0.000000e+00> : vector<2x96xf32>
    %338 = tpu.matmul %337, %11, %cst_84 {dimension_numbers = #tpu.dot_dimension_numbers<[1], [0], [0], [1], [0, 0, 1, 1], [], []>} : vector<2x32xbf16>, vector<32x96xbf16>, vector<2x96xf32> -> vector<2x96xf32>
    %339 = vector.broadcast %6 : vector<1x96xf32> to vector<2x96xf32>
    %340 = arith.addf %338, %339 : vector<2x96xf32>
    %341 = vector.extract_strided_slice %96 {offsets = [8, 0], sizes = [2, 96], strides = [1, 1]} : vector<16x96xf32> to vector<2x96xf32>
    %342 = vector.extract_strided_slice %341 {offsets = [0, 0], sizes = [2, 32], strides = [1, 1]} : vector<2x96xf32> to vector<2x32xf32>
    %343 = vector.extract_strided_slice %312 {offsets = [0, 0], sizes = [2, 32], strides = [1, 1]} : vector<2x96xf32> to vector<2x32xf32>
    %344 = arith.addf %342, %343 : vector<2x32xf32>
    %345 = arith.negf %344 : vector<2x32xf32>
    %346 = math.exp %345 : vector<2x32xf32>
    %cst_85 = arith.constant 1.000000e+00 : f32
    %347 = vector.broadcast %cst_85 : f32 to vector<2x32xf32>
    %348 = arith.addf %347, %346 : vector<2x32xf32>
    %349 = arith.divf %347, %348 : vector<2x32xf32>
    %350 = vector.extract_strided_slice %341 {offsets = [0, 32], sizes = [2, 32], strides = [1, 1]} : vector<2x96xf32> to vector<2x32xf32>
    %351 = vector.extract_strided_slice %312 {offsets = [0, 32], sizes = [2, 32], strides = [1, 1]} : vector<2x96xf32> to vector<2x32xf32>
    %352 = arith.addf %350, %351 : vector<2x32xf32>
    %353 = arith.negf %352 : vector<2x32xf32>
    %354 = math.exp %353 : vector<2x32xf32>
    %cst_86 = arith.constant 1.000000e+00 : f32
    %355 = vector.broadcast %cst_86 : f32 to vector<2x32xf32>
    %356 = arith.addf %355, %354 : vector<2x32xf32>
    %357 = arith.divf %355, %356 : vector<2x32xf32>
    %358 = vector.extract_strided_slice %341 {offsets = [0, 64], sizes = [2, 32], strides = [1, 1]} : vector<2x96xf32> to vector<2x32xf32>
    %359 = vector.extract_strided_slice %312 {offsets = [0, 64], sizes = [2, 32], strides = [1, 1]} : vector<2x96xf32> to vector<2x32xf32>
    %360 = arith.mulf %349, %359 : vector<2x32xf32>
    %361 = arith.addf %358, %360 : vector<2x32xf32>
    %362 = math.tanh %361 : vector<2x32xf32>
    %363 = arith.subf %306, %362 : vector<2x32xf32>
    %364 = arith.mulf %357, %363 : vector<2x32xf32>
    %365 = arith.addf %362, %364 : vector<2x32xf32>
    %366 = arith.truncf %365 : vector<2x32xf32> to vector<2x32xbf16>
    %cst_87 = arith.constant dense<0.000000e+00> : vector<2x192xf32>
    %367 = tpu.matmul %366, %10, %cst_87 {dimension_numbers = #tpu.dot_dimension_numbers<[1], [0], [0], [1], [0, 0, 1, 1], [], []>} : vector<2x32xbf16>, vector<32x192xbf16>, vector<2x192xf32> -> vector<2x192xf32>
    %368 = vector.broadcast %4 : vector<1x192xf32> to vector<2x192xf32>
    %369 = arith.addf %367, %368 : vector<2x192xf32>
    %370 = vector.extract_strided_slice %369 {offsets = [0, 0], sizes = [2, 96], strides = [1, 1]} : vector<2x192xf32> to vector<2x96xf32>
    %371 = vector.extract_strided_slice %369 {offsets = [0, 96], sizes = [2, 96], strides = [1, 1]} : vector<2x192xf32> to vector<2x96xf32>
    %372 = vector.extract_strided_slice %370 {offsets = [0, 0], sizes = [2, 32], strides = [1, 1]} : vector<2x96xf32> to vector<2x32xf32>
    %373 = vector.extract_strided_slice %340 {offsets = [0, 0], sizes = [2, 32], strides = [1, 1]} : vector<2x96xf32> to vector<2x32xf32>
    %374 = arith.addf %372, %373 : vector<2x32xf32>
    %375 = arith.negf %374 : vector<2x32xf32>
    %376 = math.exp %375 : vector<2x32xf32>
    %cst_88 = arith.constant 1.000000e+00 : f32
    %377 = vector.broadcast %cst_88 : f32 to vector<2x32xf32>
    %378 = arith.addf %377, %376 : vector<2x32xf32>
    %379 = arith.divf %377, %378 : vector<2x32xf32>
    %380 = vector.extract_strided_slice %370 {offsets = [0, 32], sizes = [2, 32], strides = [1, 1]} : vector<2x96xf32> to vector<2x32xf32>
    %381 = vector.extract_strided_slice %340 {offsets = [0, 32], sizes = [2, 32], strides = [1, 1]} : vector<2x96xf32> to vector<2x32xf32>
    %382 = arith.addf %380, %381 : vector<2x32xf32>
    %383 = arith.negf %382 : vector<2x32xf32>
    %384 = math.exp %383 : vector<2x32xf32>
    %cst_89 = arith.constant 1.000000e+00 : f32
    %385 = vector.broadcast %cst_89 : f32 to vector<2x32xf32>
    %386 = arith.addf %385, %384 : vector<2x32xf32>
    %387 = arith.divf %385, %386 : vector<2x32xf32>
    %388 = vector.extract_strided_slice %370 {offsets = [0, 64], sizes = [2, 32], strides = [1, 1]} : vector<2x96xf32> to vector<2x32xf32>
    %389 = vector.extract_strided_slice %340 {offsets = [0, 64], sizes = [2, 32], strides = [1, 1]} : vector<2x96xf32> to vector<2x32xf32>
    %390 = arith.mulf %379, %389 : vector<2x32xf32>
    %391 = arith.addf %388, %390 : vector<2x32xf32>
    %392 = math.tanh %391 : vector<2x32xf32>
    %393 = arith.subf %336, %392 : vector<2x32xf32>
    %394 = arith.mulf %387, %393 : vector<2x32xf32>
    %395 = arith.addf %392, %394 : vector<2x32xf32>
    %396 = arith.truncf %395 : vector<2x32xf32> to vector<2x32xbf16>
    %cst_90 = arith.constant dense<0.000000e+00> : vector<2x96xf32>
    %397 = tpu.matmul %396, %11, %cst_90 {dimension_numbers = #tpu.dot_dimension_numbers<[1], [0], [0], [1], [0, 0, 1, 1], [], []>} : vector<2x32xbf16>, vector<32x96xbf16>, vector<2x96xf32> -> vector<2x96xf32>
    %398 = vector.broadcast %6 : vector<1x96xf32> to vector<2x96xf32>
    %399 = arith.addf %397, %398 : vector<2x96xf32>
    %400 = vector.extract_strided_slice %96 {offsets = [10, 0], sizes = [2, 96], strides = [1, 1]} : vector<16x96xf32> to vector<2x96xf32>
    %401 = vector.extract_strided_slice %400 {offsets = [0, 0], sizes = [2, 32], strides = [1, 1]} : vector<2x96xf32> to vector<2x32xf32>
    %402 = vector.extract_strided_slice %371 {offsets = [0, 0], sizes = [2, 32], strides = [1, 1]} : vector<2x96xf32> to vector<2x32xf32>
    %403 = arith.addf %401, %402 : vector<2x32xf32>
    %404 = arith.negf %403 : vector<2x32xf32>
    %405 = math.exp %404 : vector<2x32xf32>
    %cst_91 = arith.constant 1.000000e+00 : f32
    %406 = vector.broadcast %cst_91 : f32 to vector<2x32xf32>
    %407 = arith.addf %406, %405 : vector<2x32xf32>
    %408 = arith.divf %406, %407 : vector<2x32xf32>
    %409 = vector.extract_strided_slice %400 {offsets = [0, 32], sizes = [2, 32], strides = [1, 1]} : vector<2x96xf32> to vector<2x32xf32>
    %410 = vector.extract_strided_slice %371 {offsets = [0, 32], sizes = [2, 32], strides = [1, 1]} : vector<2x96xf32> to vector<2x32xf32>
    %411 = arith.addf %409, %410 : vector<2x32xf32>
    %412 = arith.negf %411 : vector<2x32xf32>
    %413 = math.exp %412 : vector<2x32xf32>
    %cst_92 = arith.constant 1.000000e+00 : f32
    %414 = vector.broadcast %cst_92 : f32 to vector<2x32xf32>
    %415 = arith.addf %414, %413 : vector<2x32xf32>
    %416 = arith.divf %414, %415 : vector<2x32xf32>
    %417 = vector.extract_strided_slice %400 {offsets = [0, 64], sizes = [2, 32], strides = [1, 1]} : vector<2x96xf32> to vector<2x32xf32>
    %418 = vector.extract_strided_slice %371 {offsets = [0, 64], sizes = [2, 32], strides = [1, 1]} : vector<2x96xf32> to vector<2x32xf32>
    %419 = arith.mulf %408, %418 : vector<2x32xf32>
    %420 = arith.addf %417, %419 : vector<2x32xf32>
    %421 = math.tanh %420 : vector<2x32xf32>
    %422 = arith.subf %365, %421 : vector<2x32xf32>
    %423 = arith.mulf %416, %422 : vector<2x32xf32>
    %424 = arith.addf %421, %423 : vector<2x32xf32>
    %425 = arith.truncf %424 : vector<2x32xf32> to vector<2x32xbf16>
    %cst_93 = arith.constant dense<0.000000e+00> : vector<2x192xf32>
    %426 = tpu.matmul %425, %10, %cst_93 {dimension_numbers = #tpu.dot_dimension_numbers<[1], [0], [0], [1], [0, 0, 1, 1], [], []>} : vector<2x32xbf16>, vector<32x192xbf16>, vector<2x192xf32> -> vector<2x192xf32>
    %427 = vector.broadcast %4 : vector<1x192xf32> to vector<2x192xf32>
    %428 = arith.addf %426, %427 : vector<2x192xf32>
    %429 = vector.extract_strided_slice %428 {offsets = [0, 0], sizes = [2, 96], strides = [1, 1]} : vector<2x192xf32> to vector<2x96xf32>
    %430 = vector.extract_strided_slice %428 {offsets = [0, 96], sizes = [2, 96], strides = [1, 1]} : vector<2x192xf32> to vector<2x96xf32>
    %431 = vector.extract_strided_slice %429 {offsets = [0, 0], sizes = [2, 32], strides = [1, 1]} : vector<2x96xf32> to vector<2x32xf32>
    %432 = vector.extract_strided_slice %399 {offsets = [0, 0], sizes = [2, 32], strides = [1, 1]} : vector<2x96xf32> to vector<2x32xf32>
    %433 = arith.addf %431, %432 : vector<2x32xf32>
    %434 = arith.negf %433 : vector<2x32xf32>
    %435 = math.exp %434 : vector<2x32xf32>
    %cst_94 = arith.constant 1.000000e+00 : f32
    %436 = vector.broadcast %cst_94 : f32 to vector<2x32xf32>
    %437 = arith.addf %436, %435 : vector<2x32xf32>
    %438 = arith.divf %436, %437 : vector<2x32xf32>
    %439 = vector.extract_strided_slice %429 {offsets = [0, 32], sizes = [2, 32], strides = [1, 1]} : vector<2x96xf32> to vector<2x32xf32>
    %440 = vector.extract_strided_slice %399 {offsets = [0, 32], sizes = [2, 32], strides = [1, 1]} : vector<2x96xf32> to vector<2x32xf32>
    %441 = arith.addf %439, %440 : vector<2x32xf32>
    %442 = arith.negf %441 : vector<2x32xf32>
    %443 = math.exp %442 : vector<2x32xf32>
    %cst_95 = arith.constant 1.000000e+00 : f32
    %444 = vector.broadcast %cst_95 : f32 to vector<2x32xf32>
    %445 = arith.addf %444, %443 : vector<2x32xf32>
    %446 = arith.divf %444, %445 : vector<2x32xf32>
    %447 = vector.extract_strided_slice %429 {offsets = [0, 64], sizes = [2, 32], strides = [1, 1]} : vector<2x96xf32> to vector<2x32xf32>
    %448 = vector.extract_strided_slice %399 {offsets = [0, 64], sizes = [2, 32], strides = [1, 1]} : vector<2x96xf32> to vector<2x32xf32>
    %449 = arith.mulf %438, %448 : vector<2x32xf32>
    %450 = arith.addf %447, %449 : vector<2x32xf32>
    %451 = math.tanh %450 : vector<2x32xf32>
    %452 = arith.subf %395, %451 : vector<2x32xf32>
    %453 = arith.mulf %446, %452 : vector<2x32xf32>
    %454 = arith.addf %451, %453 : vector<2x32xf32>
    %455 = arith.truncf %454 : vector<2x32xf32> to vector<2x32xbf16>
    %cst_96 = arith.constant dense<0.000000e+00> : vector<2x96xf32>
    %456 = tpu.matmul %455, %11, %cst_96 {dimension_numbers = #tpu.dot_dimension_numbers<[1], [0], [0], [1], [0, 0, 1, 1], [], []>} : vector<2x32xbf16>, vector<32x96xbf16>, vector<2x96xf32> -> vector<2x96xf32>
    %457 = vector.broadcast %6 : vector<1x96xf32> to vector<2x96xf32>
    %458 = arith.addf %456, %457 : vector<2x96xf32>
    %459 = vector.extract_strided_slice %96 {offsets = [12, 0], sizes = [2, 96], strides = [1, 1]} : vector<16x96xf32> to vector<2x96xf32>
    %460 = vector.extract_strided_slice %459 {offsets = [0, 0], sizes = [2, 32], strides = [1, 1]} : vector<2x96xf32> to vector<2x32xf32>
    %461 = vector.extract_strided_slice %430 {offsets = [0, 0], sizes = [2, 32], strides = [1, 1]} : vector<2x96xf32> to vector<2x32xf32>
    %462 = arith.addf %460, %461 : vector<2x32xf32>
    %463 = arith.negf %462 : vector<2x32xf32>
    %464 = math.exp %463 : vector<2x32xf32>
    %cst_97 = arith.constant 1.000000e+00 : f32
    %465 = vector.broadcast %cst_97 : f32 to vector<2x32xf32>
    %466 = arith.addf %465, %464 : vector<2x32xf32>
    %467 = arith.divf %465, %466 : vector<2x32xf32>
    %468 = vector.extract_strided_slice %459 {offsets = [0, 32], sizes = [2, 32], strides = [1, 1]} : vector<2x96xf32> to vector<2x32xf32>
    %469 = vector.extract_strided_slice %430 {offsets = [0, 32], sizes = [2, 32], strides = [1, 1]} : vector<2x96xf32> to vector<2x32xf32>
    %470 = arith.addf %468, %469 : vector<2x32xf32>
    %471 = arith.negf %470 : vector<2x32xf32>
    %472 = math.exp %471 : vector<2x32xf32>
    %cst_98 = arith.constant 1.000000e+00 : f32
    %473 = vector.broadcast %cst_98 : f32 to vector<2x32xf32>
    %474 = arith.addf %473, %472 : vector<2x32xf32>
    %475 = arith.divf %473, %474 : vector<2x32xf32>
    %476 = vector.extract_strided_slice %459 {offsets = [0, 64], sizes = [2, 32], strides = [1, 1]} : vector<2x96xf32> to vector<2x32xf32>
    %477 = vector.extract_strided_slice %430 {offsets = [0, 64], sizes = [2, 32], strides = [1, 1]} : vector<2x96xf32> to vector<2x32xf32>
    %478 = arith.mulf %467, %477 : vector<2x32xf32>
    %479 = arith.addf %476, %478 : vector<2x32xf32>
    %480 = math.tanh %479 : vector<2x32xf32>
    %481 = arith.subf %424, %480 : vector<2x32xf32>
    %482 = arith.mulf %475, %481 : vector<2x32xf32>
    %483 = arith.addf %480, %482 : vector<2x32xf32>
    %484 = arith.truncf %483 : vector<2x32xf32> to vector<2x32xbf16>
    %cst_99 = arith.constant dense<0.000000e+00> : vector<2x192xf32>
    %485 = tpu.matmul %484, %10, %cst_99 {dimension_numbers = #tpu.dot_dimension_numbers<[1], [0], [0], [1], [0, 0, 1, 1], [], []>} : vector<2x32xbf16>, vector<32x192xbf16>, vector<2x192xf32> -> vector<2x192xf32>
    %486 = vector.broadcast %4 : vector<1x192xf32> to vector<2x192xf32>
    %487 = arith.addf %485, %486 : vector<2x192xf32>
    %488 = vector.extract_strided_slice %487 {offsets = [0, 0], sizes = [2, 96], strides = [1, 1]} : vector<2x192xf32> to vector<2x96xf32>
    %489 = vector.extract_strided_slice %487 {offsets = [0, 96], sizes = [2, 96], strides = [1, 1]} : vector<2x192xf32> to vector<2x96xf32>
    %490 = vector.extract_strided_slice %488 {offsets = [0, 0], sizes = [2, 32], strides = [1, 1]} : vector<2x96xf32> to vector<2x32xf32>
    %491 = vector.extract_strided_slice %458 {offsets = [0, 0], sizes = [2, 32], strides = [1, 1]} : vector<2x96xf32> to vector<2x32xf32>
    %492 = arith.addf %490, %491 : vector<2x32xf32>
    %493 = arith.negf %492 : vector<2x32xf32>
    %494 = math.exp %493 : vector<2x32xf32>
    %cst_100 = arith.constant 1.000000e+00 : f32
    %495 = vector.broadcast %cst_100 : f32 to vector<2x32xf32>
    %496 = arith.addf %495, %494 : vector<2x32xf32>
    %497 = arith.divf %495, %496 : vector<2x32xf32>
    %498 = vector.extract_strided_slice %488 {offsets = [0, 32], sizes = [2, 32], strides = [1, 1]} : vector<2x96xf32> to vector<2x32xf32>
    %499 = vector.extract_strided_slice %458 {offsets = [0, 32], sizes = [2, 32], strides = [1, 1]} : vector<2x96xf32> to vector<2x32xf32>
    %500 = arith.addf %498, %499 : vector<2x32xf32>
    %501 = arith.negf %500 : vector<2x32xf32>
    %502 = math.exp %501 : vector<2x32xf32>
    %cst_101 = arith.constant 1.000000e+00 : f32
    %503 = vector.broadcast %cst_101 : f32 to vector<2x32xf32>
    %504 = arith.addf %503, %502 : vector<2x32xf32>
    %505 = arith.divf %503, %504 : vector<2x32xf32>
    %506 = vector.extract_strided_slice %488 {offsets = [0, 64], sizes = [2, 32], strides = [1, 1]} : vector<2x96xf32> to vector<2x32xf32>
    %507 = vector.extract_strided_slice %458 {offsets = [0, 64], sizes = [2, 32], strides = [1, 1]} : vector<2x96xf32> to vector<2x32xf32>
    %508 = arith.mulf %497, %507 : vector<2x32xf32>
    %509 = arith.addf %506, %508 : vector<2x32xf32>
    %510 = math.tanh %509 : vector<2x32xf32>
    %511 = arith.subf %454, %510 : vector<2x32xf32>
    %512 = arith.mulf %505, %511 : vector<2x32xf32>
    %513 = arith.addf %510, %512 : vector<2x32xf32>
    %514 = arith.truncf %513 : vector<2x32xf32> to vector<2x32xbf16>
    %cst_102 = arith.constant dense<0.000000e+00> : vector<2x96xf32>
    %515 = tpu.matmul %514, %11, %cst_102 {dimension_numbers = #tpu.dot_dimension_numbers<[1], [0], [0], [1], [0, 0, 1, 1], [], []>} : vector<2x32xbf16>, vector<32x96xbf16>, vector<2x96xf32> -> vector<2x96xf32>
    %516 = vector.broadcast %6 : vector<1x96xf32> to vector<2x96xf32>
    %517 = arith.addf %515, %516 : vector<2x96xf32>
    %518 = vector.extract_strided_slice %96 {offsets = [14, 0], sizes = [2, 96], strides = [1, 1]} : vector<16x96xf32> to vector<2x96xf32>
    %519 = vector.extract_strided_slice %518 {offsets = [0, 0], sizes = [2, 32], strides = [1, 1]} : vector<2x96xf32> to vector<2x32xf32>
    %520 = vector.extract_strided_slice %489 {offsets = [0, 0], sizes = [2, 32], strides = [1, 1]} : vector<2x96xf32> to vector<2x32xf32>
    %521 = arith.addf %519, %520 : vector<2x32xf32>
    %522 = arith.negf %521 : vector<2x32xf32>
    %523 = math.exp %522 : vector<2x32xf32>
    %cst_103 = arith.constant 1.000000e+00 : f32
    %524 = vector.broadcast %cst_103 : f32 to vector<2x32xf32>
    %525 = arith.addf %524, %523 : vector<2x32xf32>
    %526 = arith.divf %524, %525 : vector<2x32xf32>
    %527 = vector.extract_strided_slice %518 {offsets = [0, 32], sizes = [2, 32], strides = [1, 1]} : vector<2x96xf32> to vector<2x32xf32>
    %528 = vector.extract_strided_slice %489 {offsets = [0, 32], sizes = [2, 32], strides = [1, 1]} : vector<2x96xf32> to vector<2x32xf32>
    %529 = arith.addf %527, %528 : vector<2x32xf32>
    %530 = arith.negf %529 : vector<2x32xf32>
    %531 = math.exp %530 : vector<2x32xf32>
    %cst_104 = arith.constant 1.000000e+00 : f32
    %532 = vector.broadcast %cst_104 : f32 to vector<2x32xf32>
    %533 = arith.addf %532, %531 : vector<2x32xf32>
    %534 = arith.divf %532, %533 : vector<2x32xf32>
    %535 = vector.extract_strided_slice %518 {offsets = [0, 64], sizes = [2, 32], strides = [1, 1]} : vector<2x96xf32> to vector<2x32xf32>
    %536 = vector.extract_strided_slice %489 {offsets = [0, 64], sizes = [2, 32], strides = [1, 1]} : vector<2x96xf32> to vector<2x32xf32>
    %537 = arith.mulf %526, %536 : vector<2x32xf32>
    %538 = arith.addf %535, %537 : vector<2x32xf32>
    %539 = math.tanh %538 : vector<2x32xf32>
    %540 = arith.subf %483, %539 : vector<2x32xf32>
    %541 = arith.mulf %534, %540 : vector<2x32xf32>
    %542 = arith.addf %539, %541 : vector<2x32xf32>
    %543 = arith.truncf %542 : vector<2x32xf32> to vector<2x32xbf16>
    %cst_105 = arith.constant dense<0.000000e+00> : vector<2x192xf32>
    %544 = tpu.matmul %543, %10, %cst_105 {dimension_numbers = #tpu.dot_dimension_numbers<[1], [0], [0], [1], [0, 0, 1, 1], [], []>} : vector<2x32xbf16>, vector<32x192xbf16>, vector<2x192xf32> -> vector<2x192xf32>
    %545 = vector.broadcast %4 : vector<1x192xf32> to vector<2x192xf32>
    %546 = arith.addf %544, %545 : vector<2x192xf32>
    %547 = vector.extract_strided_slice %546 {offsets = [0, 0], sizes = [2, 96], strides = [1, 1]} : vector<2x192xf32> to vector<2x96xf32>
    %548 = vector.extract_strided_slice %547 {offsets = [0, 0], sizes = [2, 32], strides = [1, 1]} : vector<2x96xf32> to vector<2x32xf32>
    %549 = vector.extract_strided_slice %517 {offsets = [0, 0], sizes = [2, 32], strides = [1, 1]} : vector<2x96xf32> to vector<2x32xf32>
    %550 = arith.addf %548, %549 : vector<2x32xf32>
    %551 = arith.negf %550 : vector<2x32xf32>
    %552 = math.exp %551 : vector<2x32xf32>
    %cst_106 = arith.constant 1.000000e+00 : f32
    %553 = vector.broadcast %cst_106 : f32 to vector<2x32xf32>
    %554 = arith.addf %553, %552 : vector<2x32xf32>
    %555 = arith.divf %553, %554 : vector<2x32xf32>
    %556 = vector.extract_strided_slice %547 {offsets = [0, 32], sizes = [2, 32], strides = [1, 1]} : vector<2x96xf32> to vector<2x32xf32>
    %557 = vector.extract_strided_slice %517 {offsets = [0, 32], sizes = [2, 32], strides = [1, 1]} : vector<2x96xf32> to vector<2x32xf32>
    %558 = arith.addf %556, %557 : vector<2x32xf32>
    %559 = arith.negf %558 : vector<2x32xf32>
    %560 = math.exp %559 : vector<2x32xf32>
    %cst_107 = arith.constant 1.000000e+00 : f32
    %561 = vector.broadcast %cst_107 : f32 to vector<2x32xf32>
    %562 = arith.addf %561, %560 : vector<2x32xf32>
    %563 = arith.divf %561, %562 : vector<2x32xf32>
    %564 = vector.extract_strided_slice %547 {offsets = [0, 64], sizes = [2, 32], strides = [1, 1]} : vector<2x96xf32> to vector<2x32xf32>
    %565 = vector.extract_strided_slice %517 {offsets = [0, 64], sizes = [2, 32], strides = [1, 1]} : vector<2x96xf32> to vector<2x32xf32>
    %566 = arith.mulf %555, %565 : vector<2x32xf32>
    %567 = arith.addf %564, %566 : vector<2x32xf32>
    %568 = math.tanh %567 : vector<2x32xf32>
    %569 = arith.subf %513, %568 : vector<2x32xf32>
    %570 = arith.mulf %563, %569 : vector<2x32xf32>
    %571 = arith.addf %568, %570 : vector<2x32xf32>
    %572 = arith.truncf %571 : vector<2x32xf32> to vector<2x32xbf16>
    %cst_108 = arith.constant dense<0.000000e+00> : vector<2x2xf32>
    %573 = tpu.matmul %572, %12, %cst_108 {dimension_numbers = #tpu.dot_dimension_numbers<[1], [0], [0], [1], [0, 0, 1, 1], [], []>} : vector<2x32xbf16>, vector<32x2xbf16>, vector<2x2xf32> -> vector<2x2xf32>
    %574 = vector.broadcast %7 : vector<1x2xf32> to vector<2x2xf32>
    %575 = arith.addf %573, %574 : vector<2x2xf32>
    %c0_109 = arith.constant 0 : index
    %c0_110 = arith.constant 0 : index
    %576 = vector.load %arg5[%c0_109, %c0_110] : memref<2x2xf32, #tpu.memory_space<vmem>>, vector<2x2xf32>
    tpu.vector_store %arg5[%c0_109, %c0_110], %575 {strides = array<i32>} : memref<2x2xf32, #tpu.memory_space<vmem>>, vector<2x2xf32>,
    return
  }
  func.func @transform_0(%arg0: i32) -> (i32, i32) {
    %c0_i32 = arith.constant 0 : i32
    %c0_i32_0 = arith.constant 0 : i32
    return %arg0, %c0_i32 : i32, i32
  }
  func.func @transform_1(%arg0: i32) -> (i32, i32) {
    %c0_i32 = arith.constant 0 : i32
    %c0_i32_0 = arith.constant 0 : i32
    %c0_i32_1 = arith.constant 0 : i32
    return %c0_i32, %c0_i32_0 : i32, i32
  }
  func.func @transform_2(%arg0: i32) -> (i32, i32) {
    %c0_i32 = arith.constant 0 : i32
    %c0_i32_0 = arith.constant 0 : i32
    %c0_i32_1 = arith.constant 0 : i32
    return %c0_i32, %c0_i32_0 : i32, i32
  }
  func.func @transform_3(%arg0: i32) -> (i32, i32) {
    %c0_i32 = arith.constant 0 : i32
    %c0_i32_0 = arith.constant 0 : i32
    %c0_i32_1 = arith.constant 0 : i32
    return %c0_i32, %c0_i32_0 : i32, i32
  }
  func.func @transform_4(%arg0: i32) -> (i32, i32) {
    %c0_i32 = arith.constant 0 : i32
    %c0_i32_0 = arith.constant 0 : i32
    return %arg0, %c0_i32 : i32, i32
  }
}

</mosaic_0001>

<bundles_post_ra>
// kernel: tpu_custom_call.1
= control target key start
LH: loop header
LB: loop body
LE: loop exit
PB: predicated region body
PF: predicated region fallthrough
CT: control target
= control target key end

     0   :  { %9 = vsyncpa [#allocation5], 0  ;;  %s3046_s0 = inlined_call_operand.vmem [shape: f32[64,1], index: 0, kind: input, shape index: {}]   ;;  %s3047_s1 = inlined_call_operand.hbm [shape: f32[1,1152], index: 1, kind: input, shape index: {}]   ;;  %s3048_s2 = inlined_call_operand.hbm [shape: bf16[8,256], index: 2, kind: input, shape index: {}]   ;;  %s3049_s3 = inlined_call_operand.vmem [shape: bf16[32,512], index: 3, kind: input, shape index: {}]   ;;  %s3050_s4 = inlined_call_operand.hbm [shape: f32[2,2], index: 4, kind: output, shape index: {}]  }
   0x1   :  { %10 = vsyncpa [#allocation8], 0 }
   0x2   :  { %11 = vsyncpa [#allocation6], 0  ;;  %s2443_s15 = smov [#allocation4]   ;;  %s2444_s17 = smov [#allocation7]  }
   0x3   :  { %s20_s16 = sshll.u32 %s2443_s15, 4  ;;  %s30_s18 = sshll.u32 %s2444_s17, 4  ;;  %s21_s16 = int_to_ptr.vmem [resolvable:$true] %s20_s16  ;;  %s31_s18 = int_to_ptr.vmem [resolvable:$true] %s30_s18 }
   0x4   :  { %s2385_s19 = scalar_lea.vmem %s21_s16, 144  ;;  %s2389_s20 = scalar_lea.vmem %s21_s16, 160 }
   0x5   :  { %p2386_p0 = scmp.ne.s32.totalorder %s21_s16, %s2385_s19  ;;  %p2390_p1 = scmp.lt.s32.totalorder %s21_s16, %s21_s16 }
   0x6   :  { %p2391_p2 = scmp.lt.s32.totalorder %s2389_s20, %s2385_s19 }
   0x8   :  { %p2392_p3 = por %p2391_p2, %p2390_p1 }
   0xa   :  { %p2393_p4 = pnand %p2392_p3, %p2386_p0 }
   0xc   :  { %2396 = shalt.err (!%p2393_p4)
}
   0xd   :  { %23 = dma.hbm_to_vmem [thread:$0]  %s3047_s1, 144, %s21_s16, [#allocation5]  }
   0xe   :  { %s2405_s23 = scalar_lea.vmem %s31_s18, 128  ;;  %p2410_p6 = scmp.lt.s32.totalorder %s31_s18, %s31_s18 }
   0xf   :  { %p2406_p5 = scmp.ne.s32.totalorder %s31_s18, %s2405_s23  ;;  %p2411_p7 = scmp.lt.s32.totalorder %s2405_s23, %s2405_s23 }
  0x11   :  { %p2412_p8 = por %p2411_p7, %p2410_p6 }
  0x13   :  { %p2413_p9 = pnand %p2412_p8, %p2406_p5 }
  0x15   :  { %2416 = shalt.err (!%p2413_p9)
}
  0x16   :  { %33 = dma.hbm_to_vmem [thread:$0]  %s3048_s2, 128, %s31_s18, [#allocation8]  }
  0x17   :  { %2437 = dma.done.wait [#allocation5], 144  }
  0x18   :  { %2438 = vsyncadd [#allocation5], 4294967152 }
  0x19   :  { %2439 = dma.done.wait [#allocation8], 128  }
  0x1a   :  { %2440 = vsyncadd [#allocation8], 4294967168  ;;  %v2445_v0 = vmov 0   ;;  %v68_v1 = vld [vmem:[%s3046_s0 + $0x18] sm:$0xff]  ;;  %v65_v2 = vld [vmem:[%s3046_s0] sm:$0xff]  ;;  %v127_v12 = vlaneseq  ;;  %s2446_s14 = smov 112  }
  0x1b   :  { %2238 = vset.pattern.permute.xlu1 %v2445_v0  ;;  %2237 = vset.pattern.permute.xlu0 %v2445_v0  ;;  %v69_v3 = vld [vmem:[%s3046_s0 + $0x20] sm:$0xff]  ;;  %v66_v4 = vld [vmem:[%s3046_s0 + $0x8] sm:$0xff]  ;;  %v67_v5 = vld [vmem:[%s3046_s0 + $0x10] sm:$0xff]  ;;  %vm340_vm1 = vcmask 1043456   ;;  %vm304_vm6 = vcmask 64512   ;;  %vm2449_vm8 = vmmov 0  }
  0x1c   :  { %90 = vperm.xlu0 %2237, %v68_v1   ;;  %75 = vperm.xlu1 %2238, %v65_v2   ;;  %v72_v6 = vld [vmem:[%s3046_s0 + $0x38] sm:$0xff]  ;;  %v70_v7 = vld [vmem:[%s3046_s0 + $0x28] sm:$0xff]  ;;  %v71_v8 = vld [vmem:[%s3046_s0 + $0x30] sm:$0xff]  ;;  %v2512_v17 = vshrl.u32 %v127_v12, 7  ;;  %s2447_s0 = smov 120   ;;  %s2450_s15 = smov 64  }
  0x1d   :  { %v2063_v9 = vld [vmem:[#allocation4] ss:$0 sm:$0xff]  ;;  %v51_v44 = vld [vmem:[#allocation7] sm:$0xf]  ;;  %v2572_v2 = vld [vmem:[#allocation4 + $0x1] ss:$0 sm:$0xff] }
  0x1e   :  { %vm160_vm0 = vcmp.lt.s32.totalorder %v2512_v17, 1  ;;  %2225 = vmatprep.subr.msk.bf16.mxu0 %vm340_vm1, %v51_v44  ;;  %v342_v45 = vsel %vm340_vm1, %v51_v44, 0  ;;  %v136_v51 = vand.u32 31, %v2512_v17  ;;  %v132_v54 = vadd.s32 32, %v2512_v17  ;;  %s2451_s16 = smov 96   ;;  %s2452_s25 = smov 32  }
  0x1f   :  { %2150 = vmatpush3.bf16.msra.mxu0 %v342_v45  ;;  %v2567_v55 = vadd.s32 24, %v2512_v17  ;;  %vm225_vm3 = vcmp.lt.s32.totalorder %v2512_v17, 7  ;;  %vm540_vm13 = vcmask 1041408   ;;  %vm543_vm14 = vcmask 1045504   ;;  %s2453_s12 = smov [#allocation9]  }
  0x20   :  { %95 = vperm.xlu0 %2237, %v69_v3   ;;  %80 = vperm.xlu1 %2238, %v66_v4   ;;  %vm144_vm2 = vcmp.eq.s32.totalorder %v136_v51, 0  ;;  %v140_v61 = vand.u32 31, %v132_v54  ;;  %vm680_vm15 = vcmask 261120   ;;  %s2053_s13 = sshll.u32 %s2453_s12, 4  ;;  %s2054_s13 = int_to_ptr.vmem [resolvable:$true] %s2053_s13 }
  0x21   :  { %v139_v63 = vand.u32 31, %v2567_v55  ;;  %p2422_p11 = scmp.lt.s32.totalorder %s2054_s13, %s2054_s13 }
  0x22   :  { %vm2576_vm4 = vcmp.eq.s32.totalorder %v140_v61, 0 }
  0x23   :  { %vm2583_vm5 = vcmp.eq.s32.totalorder %v139_v63, 31 }
  0x24   :  { %85 = vperm.xlu0 %2237, %v67_v5   ;;  %110 = vperm.xlu1 %2238, %v72_v6  }
  0x28   :  { %100 = vperm.xlu0 %2237, %v70_v7   ;;  %105 = vperm.xlu1 %2238, %v71_v8  }
  0x97   :  { %v91_v10 = vpop.permute.xlu0 %90  ;;  %v76_v11 = vpop.permute.xlu1 %75 }
  0x98   :  { %v122_v13 = vmul.f32 %v2063_v9, %v91_v10  ;;  %v119_v14 = vmul.f32 %v2063_v9, %v76_v11  ;;  %v135_v10 = vadd.s32 56, %v2512_v17 }
  0x9a   :  { %199 = vrot.lane.b32.xlu0 %v122_v13, %s2446_s14  ;;  %v152_v18 = vrot.slane %v119_v14, 7  ;;  %v155_v21 = vrot.slane %v122_v13, 7 }
  0x9b   :  { %v96_v15 = vpop.permute.xlu0 %95  ;;  %v81_v16 = vpop.permute.xlu1 %80 }
  0x9c   :  { %v123_v19 = vmul.f32 %v2063_v9, %v96_v15  ;;  %v120_v20 = vmul.f32 %v2063_v9, %v81_v16 }
  0x9e   :  { %v156_v22 = vrot.slane %v123_v19, 7  ;;  %v153_v23 = vrot.slane %v120_v20, 7  ;;  %201 = vrot.lane.b32.xlu1 %v123_v19, %s2446_s14  ;;  %193 = vrot.lane.b32.xlu0 %v119_v14, %s2446_s14 }
  0x9f   :  { %v86_v24 = vpop.permute.xlu0 %85  ;;  %v111_v25 = vpop.permute.xlu1 %110 }
  0xa0   :  { %v121_v26 = vmul.f32 %v2063_v9, %v86_v24  ;;  %v126_v27 = vmul.f32 %v2063_v9, %v111_v25  ;;  %v2519_v28 = vsel %vm160_vm0, %v152_v18, %v153_v23  ;;  %v2523_v29 = vsel %vm160_vm0, %v155_v21, %v156_v22 }
  0xa1   :  { %v173_v24 = vsel %vm2576_vm4, 0.0, %v2523_v29 }
  0xa2   :  { %v154_v30 = vrot.slane %v121_v26, 7  ;;  %v159_v31 = vrot.slane %v126_v27, 7  ;;  %195 = vrot.lane.b32.xlu1 %v120_v20, %s2446_s14  ;;  %197 = vrot.lane.b32.xlu0 %v121_v26, %s2446_s14 }
  0xa3   :  { %v101_v32 = vpop.permute.xlu0 %100  ;;  %v106_v33 = vpop.permute.xlu1 %105 }
  0xa4   :  { %v124_v34 = vmul.f32 %v2063_v9, %v101_v32  ;;  %v125_v35 = vmul.f32 %v2063_v9, %v106_v33  ;;  %v168_v36 = vsel %vm160_vm0, %v159_v31, %v152_v18  ;;  %v166_v37 = vsel %vm160_vm0, %v153_v23, %v154_v30 }
  0xa5   :  { %v2533_v38 = vsel %vm160_vm0, %v154_v30, %v155_v21  ;;  %v169_v60 = vsel %vm144_vm2, 0.0, %v168_v36 }
  0xa6   :  { %v157_v39 = vrot.slane %v124_v34, 7  ;;  %v158_v40 = vrot.slane %v125_v35, 7  ;;  %207 = vrot.lane.b32.xlu1 %v126_v27, %s2446_s14  ;;  %203 = vrot.lane.b32.xlu0 %v124_v34, %s2446_s14 }
  0xa8   :  { %v2539_v41 = vsel %vm160_vm0, %v156_v22, %v157_v39  ;;  %v2543_v42 = vsel %vm160_vm0, %v157_v39, %v158_v40  ;;  %v2547_v43 = vsel %vm160_vm0, %v158_v40, %v159_v31 }
  0xaa   :  { %205 = vrot.lane.b32.xlu1 %v125_v35, %s2446_s14  ;;  %242 = vrot.lane.b32.xlu0 %v119_v14, %s2447_s0 }
  0xae   :  { %244 = vrot.lane.b32.xlu1 %v120_v20, %s2447_s0  ;;  %246 = vrot.lane.b32.xlu0 %v121_v26, %s2447_s0  ;;  %v143_v26 = vand.u32 31, %v135_v10 }
  0xb0   :  { %vm184_vm7 = vcmp.eq.s32.totalorder %v143_v26, 31  ;;  %v2448_v26 = vmov 0.0  }
  0xb1   :  { %2155 = vmatprep.subr.bf16.mxu1 %v2448_v26  ;;  %2157 = vmatprep.mubr.msk.bf16.mxu1 %vm2449_vm8, %v2448_v26 }
  0xb2   :  { %248 = vrot.lane.b32.xlu1 %v122_v13, %s2447_s0  ;;  %250 = vrot.lane.b32.xlu0 %v123_v19, %s2447_s0 }
  0xb6   :  { %252 = vrot.lane.b32.xlu1 %v124_v34, %s2447_s0  ;;  %254 = vrot.lane.b32.xlu0 %v125_v35, %s2447_s0 }
  0xba   :  { %256 = vrot.lane.b32.xlu1 %v126_v27, %s2447_s0 }
 0x10c   :  { %v200_v46 = vpop.permute.xlu0 %199 }
 0x10d   :  { %v220_v6 = vrot.slane %v200_v46, 1 }
 0x110   :  { %v202_v47 = vpop.permute.xlu1 %201  ;;  %v2560_v48 = vpop.permute.xlu0 %193 }
 0x111   :  { %v217_v57 = vrot.slane %v2560_v48, 1  ;;  %v221_v4 = vrot.slane %v202_v47, 1 }
 0x113   :  { %v229_v22 = vsel %vm225_vm3, %v220_v6, %v221_v4 }
 0x114   :  { %v196_v49 = vpop.permute.xlu1 %195  ;;  %v198_v50 = vpop.permute.xlu0 %197  ;;  %v237_v34 = vsel %vm2583_vm5, 0.0, %v229_v22 }
 0x115   :  { %v218_v56 = vrot.slane %v196_v49, 1  ;;  %v219_v1 = vrot.slane %v198_v50, 1 }
 0x117   :  { %v232_v3 = vsel %vm225_vm3, %v217_v57, %v218_v56  ;;  %v231_v16 = vsel %vm225_vm3, %v218_v56, %v219_v1  ;;  %v230_v18 = vsel %vm225_vm3, %v219_v1, %v220_v6 }
 0x118   :  { %v2563_v52 = vpop.permute.xlu1 %207  ;;  %v204_v53 = vpop.permute.xlu0 %203 }
 0x119   :  { %v222_v15 = vrot.slane %v204_v53, 1  ;;  %v224_v32 = vrot.slane %v2563_v52, 1 }
 0x11b   :  { %v228_v29 = vsel %vm225_vm3, %v221_v4, %v222_v15  ;;  %v233_v50 = vsel %vm225_vm3, %v224_v32, %v217_v57 }
 0x11c   :  { %v206_v58 = vpop.permute.xlu1 %205  ;;  %v243_v59 = vpop.permute.xlu0 %242 }
 0x11d   :  { %v266_v62 = vadd.f32 %v243_v59, %v169_v60  ;;  %v223_v33 = vrot.slane %v206_v58, 1  ;;  %v241_v59 = vsel %vm184_vm7, 0.0, %v233_v50 }
 0x11f   :  { %v274_v5 = vadd.f32 %v266_v62, %v232_v3  ;;  %v227_v48 = vsel %vm225_vm3, %v222_v15, %v223_v33  ;;  %v226_v49 = vsel %vm225_vm3, %v223_v33, %v224_v32  ;;  %v129_v32 = vadd.s32 8, %v2512_v17 }
 0x120   :  { %v245_v7 = vpop.permute.xlu1 %244  ;;  %v247_v8 = vpop.permute.xlu0 %246 }
 0x121   :  { %v288_v11 = vadd.f32 %v2572_v2, %v274_v5  ;;  %v267_v12 = vadd.f32 %v245_v7, %v2519_v28  ;;  %v268_v13 = vadd.f32 %v247_v8, %v166_v37 }
 0x123   :  { %v296_v19 = vmax.f32 %v288_v11, 0.0  ;;  %v275_v20 = vadd.f32 %v267_v12, %v231_v16  ;;  %v276_v21 = vadd.f32 %v268_v13, %v230_v18 }
 0x124   :  { %v249_v23 = vpop.permute.xlu1 %248  ;;  %v251_v25 = vpop.permute.xlu0 %250 }
 0x125   :  { %305 = vst.msk [vmem:[#allocation2] sm:$0xff] %vm304_vm6, %v296_v19  ;;  %v289_v27 = vadd.f32 %v2572_v2, %v275_v20  ;;  %v290_v28 = vadd.f32 %v2572_v2, %v276_v21  ;;  %v269_v30 = vadd.f32 %v249_v23, %v2533_v38  ;;  %v270_v31 = vadd.f32 %v251_v25, %v173_v24  ;;  %v52_v24 = vld [vmem:[#allocation7 + $0x4] sm:$0xf] }
 0x126   :  { %v559_v25 = vsel %vm340_vm1, %v52_v24, 0 }
 0x127   :  { %v297_v35 = vmax.f32 %v289_v27, 0.0  ;;  %v298_v36 = vmax.f32 %v290_v28, 0.0  ;;  %v277_v37 = vadd.f32 %v269_v30, %v237_v34  ;;  %v278_v39 = vadd.f32 %v270_v31, %v228_v29  ;;  %2156 = vmatpush3.bf16.msra.mxu1 %v559_v25  ;;  %v2646_v27 = vld [vmem:[#allocation4 + $0x6] ss:$0 sm:$0xff] }
 0x128   :  { %v253_v40 = vpop.permute.xlu1 %252  ;;  %v255_v44 = vpop.permute.xlu0 %254  ;;  %2161 = vmatprep.subr.bf16.mxu1 %v2448_v26  ;;  %v130_v30 = vadd.s32 16, %v2512_v17  ;;  %v393_v31 = vand.u32 15, %v2512_v17 }
 0x129   :  { %306 = vst.msk [vmem:[#allocation2 + $0x8] sm:$0xff] %vm304_vm6, %v297_v35  ;;  %307 = vst.msk [vmem:[#allocation2 + $0x10] sm:$0xff] %vm304_vm6, %v298_v36  ;;  %v291_v38 = vadd.f32 %v2572_v2, %v277_v37  ;;  %v292_v45 = vadd.f32 %v2572_v2, %v278_v39  ;;  %v271_v46 = vadd.f32 %v253_v40, %v2539_v41  ;;  %v394_v36 = vand.u32 15, %v129_v32 }
 0x12a   :  { %v272_v47 = vadd.f32 %v255_v44, %v2543_v42  ;;  %v395_v35 = vand.u32 15, %v130_v30  ;;  %vm397_vm9 = vcmp.eq.s32.totalorder %v393_v31, 0 }
 0x12b   :  { %v299_v51 = vmax.f32 %v291_v38, 0.0  ;;  %v300_v52 = vmax.f32 %v292_v45, 0.0  ;;  %v279_v53 = vadd.f32 %v271_v46, %v227_v48  ;;  %vm414_vm11 = vcmp.eq.s32.totalorder %v394_v36, 15 }
 0x12c   :  { %v280_v54 = vadd.f32 %v272_v47, %v226_v49  ;;  %v257_v56 = vpop.permute.xlu1 %256  ;;  %vm2653_vm10 = vcmp.eq.s32.totalorder %v395_v35, 0 }
 0x12d   :  { %308 = vst.msk [vmem:[#allocation2 + $0x18] sm:$0xff] %vm304_vm6, %v299_v51  ;;  %309 = vst.msk [vmem:[#allocation2 + $0x20] sm:$0xff] %vm304_vm6, %v300_v52  ;;  %v293_v41 = vadd.f32 %v2572_v2, %v279_v53  ;;  %v273_v58 = vadd.f32 %v257_v56, %v2547_v43  ;;  %v2067_v51 = vld [vmem:[#allocation4 + $0x2] ss:$0 sm:$0xff]  ;;  %v396_v53 = vand.u32 15, %v2567_v55 }
 0x12e   :  { %v294_v42 = vadd.f32 %v2572_v2, %v280_v54 }
 0x12f   :  { %v301_v60 = vmax.f32 %v293_v41, 0.0  ;;  %v281_v62 = vadd.f32 %v273_v58, %v241_v59  ;;  %vm416_vm12 = vcmp.eq.s32.totalorder %v396_v53, 15 }
 0x130   :  { %v302_v61 = vmax.f32 %v294_v42, 0.0  ;;  %v313_v63 = vld [vmem:[#allocation2] ss:$2 sm:$0xff]  ;;  %v321_v1 = vld [vmem:[#allocation2 + $0x1] ss:$2 sm:$0xff] }
 0x131   :  { %310 = vst.msk [vmem:[#allocation2 + $0x28] sm:$0xff] %vm304_vm6, %v301_v60  ;;  %v295_v57 = vadd.f32 %v2572_v2, %v281_v62  ;;  %v328_v6 = vmax.f32 %v313_v63, %v321_v1 }
 0x132   :  { %311 = vst.msk [vmem:[#allocation2 + $0x30] sm:$0xff] %vm304_vm6, %v302_v61 }
 0x133   :  { %v303_v3 = vmax.f32 %v295_v57, 0.0 }
 0x134   :  { %v315_v4 = vld [vmem:[#allocation2 + $0x10] ss:$2 sm:$0xff]  ;;  %v323_v5 = vld [vmem:[#allocation2 + $0x11] ss:$2 sm:$0xff] }
 0x135   :  { %312 = vst.msk [vmem:[#allocation2 + $0x38] sm:$0xff] %vm304_vm6, %v303_v3  ;;  %v329_v7 = vmax.f32 %v315_v4, %v323_v5 }
 0x137   :  { %v332_v43 = vpack.c.bf16 %v329_v7, %v328_v6 }
 0x138   :  { %v317_v8 = vld [vmem:[#allocation2 + $0x20] ss:$2 sm:$0xff]  ;;  %v325_v9 = vld [vmem:[#allocation2 + $0x21] ss:$2 sm:$0xff] }
 0x139   :  { %2151 = vmatprep.mubr.msk.bf16.mxu0 %vm304_vm6, %v332_v43  ;;  %v330_v12 = vmax.f32 %v317_v8, %v325_v9 }
 0x13c   :  { %v319_v10 = vld [vmem:[#allocation2 + $0x30] ss:$2 sm:$0xff]  ;;  %v327_v11 = vld [vmem:[#allocation2 + $0x31] ss:$2 sm:$0xff] }
 0x13d   :  { %v331_v13 = vmax.f32 %v319_v10, %v327_v11 }
 0x13f   :  { %v333_v14 = vpack.c.bf16 %v331_v13, %v330_v12 }
 0x141   :  { %2152 = vmatmul.mubr.msk.bf16.vlgmr.msra.gmra.mxu0 %vm304_vm6, %v333_v14 }
 0x142   :  { %716 = vmatprep.mubr.bf16.mxu0 %v2445_v0 }
 0x201   :  { %v2153_v2 = vpop.f32.mrf.mxu0 }
 0x202   :  { %425 = vrot.lane.b32.xlu0 %v2153_v2, %s2446_s14  ;;  %v403_v18 = vrot.slane %v2153_v2, 7 }
 0x203   :  { %v378_v15 = vpop.f32.mrf.mxu0 }
 0x204   :  { %v401_v19 = vrot.slane %v378_v15, 7 }
 0x205   :  { %v2154_v16 = vpop.f32.mrf.mxu0 }
 0x206   :  { %v404_v20 = vrot.slane %v2154_v16, 7  ;;  %421 = vrot.lane.b32.xlu0 %v378_v15, %s2446_s14  ;;  %427 = vrot.lane.b32.xlu1 %v2154_v16, %s2446_s14 }
 0x207   :  { %v381_v23 = vpop.f32.mrf.mxu0 }
 0x208   :  { %v408_v21 = vsel %vm160_vm0, %v404_v20, %v401_v19  ;;  %v405_v22 = vsel %vm160_vm0, %v403_v18, %v404_v20  ;;  %v402_v33 = vrot.slane %v381_v23, 7 }
 0x209   :  { %v409_v39 = vsel %vm397_vm9, 0.0, %v408_v21 }
 0x20a   :  { %445 = vrot.lane.b32.xlu0 %v378_v15, %s2447_s0  ;;  %423 = vrot.lane.b32.xlu1 %v381_v23, %s2446_s14  ;;  %v406_v38 = vsel %vm160_vm0, %v402_v33, %v403_v18  ;;  %v407_v58 = vsel %vm160_vm0, %v401_v19, %v402_v33  ;;  %vm2045_vm0 = vcmask 9216  }
 0x20b   :  { %v411_v41 = vsel %vm2653_vm10, 0.0, %v406_v38 }
 0x20e   :  { %449 = vrot.lane.b32.xlu0 %v2153_v2, %s2447_s0  ;;  %447 = vrot.lane.b32.xlu1 %v381_v23, %s2447_s0 }
 0x212   :  { %451 = vrot.lane.b32.xlu1 %v2154_v16, %s2447_s0  ;;  %624 = vrot.lane.b32.xlu0 %v2646_v27, %s2450_s15 }
 0x274   :  { %v426_v28 = vpop.permute.xlu0 %425 }
 0x275   :  { %v435_v45 = vrot.slane %v426_v28, 1 }
 0x278   :  { %v422_v34 = vpop.permute.xlu0 %421  ;;  %v428_v29 = vpop.permute.xlu1 %427 }
 0x279   :  { %v433_v46 = vrot.slane %v422_v34, 1  ;;  %v436_v49 = vrot.slane %v428_v29, 1 }
 0x27b   :  { %v437_v61 = vsel %vm225_vm3, %v435_v45, %v436_v49  ;;  %v440_v55 = vsel %vm225_vm3, %v436_v49, %v433_v46 }
 0x27c   :  { %v446_v37 = vpop.permute.xlu0 %445  ;;  %v424_v40 = vpop.permute.xlu1 %423  ;;  %v444_v43 = vsel %vm416_vm12, 0.0, %v440_v55 }
 0x27d   :  { %v457_v47 = vadd.f32 %v446_v37, %v409_v39  ;;  %v434_v48 = vrot.slane %v424_v40, 1 }
 0x27f   :  { %v439_v50 = vsel %vm225_vm3, %v433_v46, %v434_v48  ;;  %v438_v52 = vsel %vm225_vm3, %v434_v48, %v435_v45 }
 0x280   :  { %v461_v54 = vadd.f32 %v457_v47, %v439_v50  ;;  %v450_v56 = vpop.permute.xlu0 %449  ;;  %v448_v42 = vpop.permute.xlu1 %447  ;;  %v442_v57 = vsel %vm414_vm11, 0.0, %v438_v52 }
 0x281   :  { %v459_v59 = vadd.f32 %v450_v56, %v411_v41  ;;  %v458_v60 = vadd.f32 %v448_v42, %v407_v58  ;;  %v2068_v56 = vld [vmem:[#allocation4 + $0x3] ss:$0 sm:$0xff] }
 0x282   :  { %v471_v62 = vadd.f32 %v2067_v51, %v461_v54 }
 0x283   :  { %v463_v63 = vadd.f32 %v459_v59, %v437_v61  ;;  %v462_v1 = vadd.f32 %v458_v60, %v442_v57 }
 0x284   :  { %v475_v3 = vmax.f32 %v471_v62, 0.0  ;;  %v452_v4 = vpop.permute.xlu1 %451  ;;  %v625_v55 = vpop.permute.xlu0 %624 }
 0x285   :  { %v473_v5 = vadd.f32 %v2067_v51, %v463_v63  ;;  %v472_v6 = vadd.f32 %v2067_v51, %v462_v1  ;;  %v460_v7 = vadd.f32 %v452_v4, %v405_v22 }
 0x286   :  { %479 = vst.msk [vmem:[#allocation3] sm:$0xff] %vm304_vm6, %v475_v3 }
 0x287   :  { %v477_v8 = vmax.f32 %v473_v5, 0.0  ;;  %v476_v9 = vmax.f32 %v472_v6, 0.0  ;;  %v464_v10 = vadd.f32 %v460_v7, %v444_v43  ;;  %v2695_v43 = vld [vmem:[%s3049_s3 + $0x24] ss:$16 sps:$4 sm:$0xff]  }
 0x288   :  { %696 = vmatprep.subr.bf16.mxu0 %v2695_v43 }
 0x289   :  { %481 = vst.msk [vmem:[#allocation3 + $0x10] sm:$0xff] %vm304_vm6, %v477_v8  ;;  %480 = vst.msk [vmem:[#allocation3 + $0x8] sm:$0xff] %vm304_vm6, %v476_v9  ;;  %v474_v11 = vadd.f32 %v2067_v51, %v464_v10  ;;  %v2700_v8 = vld [vmem:[%s3049_s3 + $0x20] ss:$16 sps:$4 sm:$0xff]   ;;  %v2705_v9 = vld [vmem:[%s3049_s3 + $0x4] ss:$16 sps:$4 sm:$0xff]  }
 0x28a   :  { %697 = vmatpush1.bf16.msra.mxu0 %v2700_v8  ;;  %v2712_v10 = vld [vmem:[%s3049_s3] ss:$16 sps:$4 sm:$0xff]  }
 0x28b   :  { %v478_v12 = vmax.f32 %v474_v11, 0.0  ;;  %698 = vmatprep.subr.bf16.mxu0 %v2705_v9 }
 0x28d   :  { %482 = vst.msk [vmem:[#allocation3 + $0x18] sm:$0xff] %vm304_vm6, %v478_v12 }
 0x28e   :  { %699 = vmatpush1.bf16.msra.mxu0 %v2712_v10 }
 0x28f   :  { %882 = vmatprep.subr.bf16.mxu0 %v2695_v43 }
 0x290   :  { %v488_v13 = vld [vmem:[#allocation3 + $0x2] ss:$16 sm:$0x3]  ;;  %v490_v14 = vld [vmem:[#allocation3 + $0x3] ss:$16 sm:$0x3] }
 0x291   :  { %v493_v2 = vld [vmem:[#allocation3 + $0x4] ss:$16 sm:$0x3]  ;;  %v495_v15 = vld [vmem:[#allocation3 + $0x5] ss:$16 sm:$0x3]  ;;  %v491_v21 = vmax.f32 %v488_v13, %v490_v14 }
 0x292   :  { %v483_v16 = vld [vmem:[#allocation3] ss:$16 sm:$0x3]  ;;  %v485_v18 = vld [vmem:[#allocation3 + $0x1] ss:$16 sm:$0x3]  ;;  %v496_v22 = vmax.f32 %v493_v2, %v495_v15 }
 0x293   :  { %v498_v19 = vld [vmem:[#allocation3 + $0x6] ss:$16 sm:$0x3]  ;;  %v500_v20 = vld [vmem:[#allocation3 + $0x7] ss:$16 sm:$0x3]  ;;  %v486_v36 = vmax.f32 %v483_v16, %v485_v18 }
 0x294   :  { %v503_v23 = vld [vmem:[#allocation3 + $0x8] ss:$16 sm:$0x3]  ;;  %v505_v24 = vld [vmem:[#allocation3 + $0x9] ss:$16 sm:$0x3]  ;;  %v501_v33 = vmax.f32 %v498_v19, %v500_v20 }
 0x295   :  { %v508_v25 = vld [vmem:[#allocation3 + $0xa] ss:$16 sm:$0x3]  ;;  %v510_v28 = vld [vmem:[#allocation3 + $0xb] ss:$16 sm:$0x3]  ;;  %v506_v44 = vmax.f32 %v503_v23, %v505_v24 }
 0x296   :  { %v511_v30 = vmax.f32 %v508_v25, %v510_v28  ;;  %v513_v31 = vld [vmem:[#allocation3 + $0xc] ss:$16 sm:$0x3]  ;;  %v515_v32 = vld [vmem:[#allocation3 + $0xd] ss:$16 sm:$0x3] }
 0x297   :  { %v516_v34 = vmax.f32 %v513_v31, %v515_v32  ;;  %v518_v29 = vld [vmem:[#allocation3 + $0xe] ss:$16 sm:$0x3]  ;;  %v520_v35 = vld [vmem:[#allocation3 + $0xf] ss:$16 sm:$0x3] }
 0x298   :  { %v521_v37 = vmax.f32 %v518_v29, %v520_v35  ;;  %v523_v39 = vrot.slane %v491_v21, 6  ;;  %v526_v40 = vrot.slane %v496_v22, 4  ;;  %v532_v38 = vrot.slane %v511_v30, 6  ;;  %v47_v18 = vld [vmem:[#allocation4 + $0x4] sm:$0x3] }
 0x299   :  { %v535_v45 = vrot.slane %v516_v34, 4  ;;  %v529_v47 = vrot.slane %v501_v33, 2  ;;  %v649_v16 = vsub.s32 0, %v2512_v17  ;;  %v653_v19 = vsub.s32 1, %v2512_v17 }
 0x29a   :  { %v541_v46 = vsel %vm540_vm13, %v486_v36, %v523_v39  ;;  %v538_v48 = vrot.slane %v521_v37, 2  ;;  %v545_v50 = vsel %vm540_vm13, %v506_v44, %v532_v38 }
 0x29b   :  { %v542_v49 = vsel %vm340_vm1, %v541_v46, %v526_v40  ;;  %v546_v51 = vsel %vm340_vm1, %v545_v50, %v535_v45  ;;  %v2727_v20 = vrot.slane %v47_v18, %v649_v16  ;;  %v2729_v21 = vrot.slane %v47_v18, %v653_v19 }
 0x29c   :  { %v544_v52 = vsel %vm543_vm14, %v542_v49, %v529_v47  ;;  %v547_v53 = vsel %vm543_vm14, %v546_v51, %v538_v48  ;;  %v2740_v48 = vld [vmem:[#allocation4 + $0x7] ss:$0 sm:$0xff] }
 0x29d   :  { %v548_v54 = vpack.c.bf16 %v547_v53, %v544_v52 }
 0x29f   :  { %2158 = vmatmul.mubr.msk.bf16.vlgmr.msra.gmra.mxu1 %vm304_vm6, %v548_v54 }
 0x2a0   :  { %2165 = vmatprep.mubr.msk.bf16.mxu1 %vm2449_vm8, %v2448_v26 }
 0x35f   :  { %v595_v41 = vpop.f32.mrf.mxu1 }
 0x360   :  { %v2683_v42 = vadd.f32 %v2068_v56, %v595_v41 }
 0x361   :  { %v2159_v58 = vpop.f32.mrf.mxu1 }
 0x362   :  { %v616_v59 = vadd.f32 %v2646_v27, %v2683_v42 }
 0x363   :  { %v598_v60 = vpop.f32.mrf.mxu1 }
 0x364   :  { %v2687_v61 = vadd.f32 %v2068_v56, %v598_v60  ;;  %v2072_v62 = vmul.f32 -1.442695, %v616_v59 }
 0x365   :  { %v2160_v57 = vpop.f32.mrf.mxu1 }
 0x366   :  { %2249 = vpow2.f32 %v2072_v62 }
 0x373   :  { %v2250_v63 = vpop.eup %2249 }
 0x374   :  { %v620_v1 = vadd.f32 1.0, %v2250_v63 }
 0x376   :  { %2251 = vrcp.f32 %v620_v1 }
 0x383   :  { %v2252_v3 = vpop.eup %2251 }
 0x384   :  { %v627_v4 = vmul.f32 %v2252_v3, %v625_v55 }
 0x386   :  { %629 = vrot.lane.b32.xlu1 %v627_v4, %s2450_s15 }
 0x3f8   :  { %v630_v5 = vpop.permute.xlu1 %629 }
 0x3f9   :  { %v632_v6 = vadd.f32 %v630_v5, %v2683_v42 }
 0x3fb   :  { %2253 = vtanh.f32 %v632_v6 }
 0x408   :  { %v2254_v7 = vpop.eup %2253 }
 0x409   :  { %v634_v27 = vsub.f32 0.0, %v2254_v7 }
 0x40b   :  { %636 = vrot.lane.b32.xlu0 %v634_v27, %s2451_s16 }
 0x47d   :  { %v637_v11 = vpop.permute.xlu0 %636 }
 0x47e   :  { %v639_v12 = vmul.f32 %v2252_v3, %v637_v11 }
 0x480   :  { %641 = vrot.lane.b32.xlu1 %v639_v12, %s2452_s25 }
 0x4f2   :  { %v642_v13 = vpop.permute.xlu1 %641 }
 0x4f3   :  { %v644_v14 = vadd.f32 %v2254_v7, %v642_v13 }
 0x4f5   :  { %v645_v2 = vpack.c.bf16 %v644_v14, %v644_v14 }
 0x4f7   :  { %658 = vrot.lane.b32.xlu0 %v645_v2, %s2450_s15  ;;  %v2764_v2 = vld [vmem:[%s3049_s3 + $0x28] ss:$16 sps:$4 sm:$0xff]  }
 0x4f8   :  { %2162 = vmatpush3.bf16.msra.mxu1 %v2764_v2 }
 0x4f9   :  { %2163 = vmatprep.subr.bf16.mxu1 %v2448_v26 }
 0x569   :  { %v659_v15 = vpop.permute.xlu0 %658 }
 0x56a   :  { %2077 = vmatmul.mubr.msk.bf16.vlgmr.msra.gmra.mxu0 %vm680_vm15, %v659_v15  ;;  %v2770_v15 = vld [vmem:[%s3049_s3 + $0x8] ss:$16 sps:$4 sm:$0xff]  }
 0x56b   :  { %883 = vmatpush1.bf16.msra.mxu0 %v2700_v8  ;;  %902 = vmatprep.mubr.bf16.mxu0 %v2445_v0 }
 0x56c   :  { %884 = vmatprep.subr.bf16.mxu0 %v2705_v9  ;;  %2164 = vmatpush3.bf16.msra.mxu1 %v2770_v15 }
 0x56d   :  { %2169 = vmatprep.subr.bf16.mxu1 %v2448_v26 }
 0x56f   :  { %885 = vmatpush1.bf16.msra.mxu0 %v2712_v10 }
 0x570   :  { %1056 = vmatprep.subr.bf16.mxu0 %v2695_v43 }
 0x62a   :  { %v718_v22 = vpop.f32.mrf.mxu0 }
 0x62b   :  { %v719_v23 = vadd.f32 %v718_v22, %v2727_v20 }
 0x62c   :  { %v720_v24 = vpop.f32.mrf.mxu0 }
 0x62d   :  { %v721_v25 = vadd.f32 %v720_v24, %v2729_v21  ;;  %v814_v28 = vrot.slane %v719_v23, 6  ;;  %v725_v51 = vadd.f32 %v2740_v48, %v719_v23 }
 0x62e   :  { %v722_v30 = vpop.f32.mrf.mxu0 }
 0x62f   :  { %v826_v31 = vrot.slane %v721_v25, 6  ;;  %815 = vrot.lane.b32.xlu1 %v814_v28, %s2452_s25  ;;  %v2078_v53 = vmul.f32 -1.442695, %v725_v51 }
 0x630   :  { %v723_v32 = vpop.f32.mrf.mxu0 }
 0x631   :  { %837 = vrot.lane.b32.xlu0 %v826_v31, %s2451_s16 }
 0x635   :  { %827 = vrot.lane.b32.xlu0 %v826_v31, %s2452_s25 }
 0x6a1   :  { %v816_v17 = vpop.permute.xlu1 %815 }
 0x6a2   :  { %v818_v33 = vadd.f32 %v816_v17, %v2683_v42 }
 0x6a3   :  { %v838_v37 = vpop.permute.xlu0 %837 }
 0x6a4   :  { %v2082_v34 = vmul.f32 -1.442695, %v818_v33 }
 0x6a6   :  { %2255 = vpow2.f32 %v2082_v34 }
 0x6a7   :  { %v828_v49 = vpop.permute.xlu0 %827 }
 0x6a8   :  { %v830_v50 = vadd.f32 %v828_v49, %v2683_v42 }
 0x6aa   :  { %v2083_v52 = vmul.f32 -1.442695, %v830_v50 }
 0x6b3   :  { %v2256_v29 = vpop.eup %2255 }
 0x6b4   :  { %v822_v35 = vadd.f32 1.0, %v2256_v29 }
 0x6b6   :  { %2257 = vrcp.f32 %v822_v35 }
 0x6c3   :  { %v2258_v36 = vpop.eup %2257 }
 0x6c4   :  { %v840_v39 = vmul.f32 %v2258_v36, %v838_v37 }
 0x6c6   :  { %842 = vrot.lane.b32.xlu1 %v840_v39, %s2450_s15 }
 0x738   :  { %v843_v40 = vpop.permute.xlu1 %842 }
 0x739   :  { %v845_v44 = vadd.f32 %v843_v40, %v2683_v42 }
 0x73b   :  { %2259 = vtanh.f32 %v845_v44 }
 0x73c   :  { %2261 = vpow2.f32 %v2083_v52 }
 0x73d   :  { %2263 = vpow2.f32 %v2078_v53 }
 0x748   :  { %v2260_v38 = vpop.eup %2259 }
 0x749   :  { %v848_v45 = vrot.slane %v2260_v38, 2  ;;  %v2262_v54 = vpop.eup %2261 }
 0x74a   :  { %v834_v56 = vadd.f32 1.0, %v2262_v54  ;;  %v2264_v41 = vpop.eup %2263 }
 0x74b   :  { %v850_v46 = vsub.f32 %v644_v14, %v848_v45  ;;  %v729_v58 = vadd.f32 1.0, %v2264_v41 }
 0x74c   :  { %2265 = vrcp.f32 %v834_v56 }
 0x74d   :  { %v852_v47 = vrot.slane %v850_v46, 6  ;;  %2267 = vrcp.f32 %v729_v58 }
 0x74f   :  { %853 = vrot.lane.b32.xlu1 %v852_v47, %s2451_s16 }
 0x753   :  { %733 = vrot.lane.b32.xlu1 %v2740_v48, %s2450_s15 }
 0x759   :  { %v2266_v59 = vpop.eup %2265 }
 0x75a   :  { %v2268_v57 = vpop.eup %2267 }
 0x7c1   :  { %v854_v60 = vpop.permute.xlu1 %853 }
 0x7c2   :  { %v856_v62 = vmul.f32 %v2266_v59, %v854_v60 }
 0x7c4   :  { %858 = vrot.lane.b32.xlu0 %v856_v62, %s2452_s25 }
 0x7c5   :  { %v734_v63 = vpop.permute.xlu1 %733 }
 0x7c6   :  { %v736_v1 = vmul.f32 %v2268_v57, %v734_v63 }
 0x7c8   :  { %738 = vrot.lane.b32.xlu1 %v736_v1, %s2450_s15 }
 0x836   :  { %v859_v55 = vpop.permute.xlu0 %858 }
 0x837   :  { %v2748_v3 = vadd.f32 %v2260_v38, %v859_v55 }
 0x839   :  { %v862_v4 = vpack.c.bf16 %v2748_v3, %v2748_v3 }
 0x83a   :  { %v739_v5 = vpop.permute.xlu1 %738 }
 0x83b   :  { %v864_v6 = vrot.slane %v862_v4, 1  ;;  %v741_v7 = vadd.f32 %v739_v5, %v719_v23 }
 0x83d   :  { %2269 = vtanh.f32 %v741_v7  ;;  %865 = vrot.lane.b32.xlu0 %v864_v6, %s2450_s15 }
 0x84a   :  { %v2270_v27 = vpop.eup %2269 }
 0x84b   :  { %v743_v11 = vsub.f32 0.0, %v2270_v27 }
 0x84d   :  { %745 = vrot.lane.b32.xlu0 %v743_v11, %s2451_s16 }
 0x8af   :  { %v866_v12 = vpop.permute.xlu0 %865 }
 0x8b0   :  { %2084 = vmatmul.mubr.msk.bf16.vlgmr.msra.gmra.mxu0 %vm680_vm15, %v866_v12 }
 0x8b1   :  { %1057 = vmatpush1.bf16.msra.mxu0 %v2700_v8  ;;  %1076 = vmatprep.mubr.bf16.mxu0 %v2445_v0 }
 0x8b2   :  { %1058 = vmatprep.subr.bf16.mxu0 %v2705_v9 }
 0x8b5   :  { %1059 = vmatpush1.bf16.msra.mxu0 %v2712_v10 }
 0x8b6   :  { %1230 = vmatprep.subr.bf16.mxu0 %v2695_v43 }
 0x8bf   :  { %v746_v13 = vpop.permute.xlu0 %745 }
 0x8c0   :  { %v748_v14 = vmul.f32 %v2268_v57, %v746_v13 }
 0x8c2   :  { %750 = vrot.lane.b32.xlu1 %v748_v14, %s2452_s25 }
 0x934   :  { %v751_v16 = vpop.permute.xlu1 %750 }
 0x935   :  { %v2775_v18 = vadd.f32 %v2270_v27, %v751_v16 }
 0x937   :  { %v754_v19 = vpack.c.bf16 %v2775_v18, %v2775_v18 }
 0x939   :  { %756 = vrot.lane.b32.xlu0 %v754_v19, %s2450_s15 }
 0x970   :  { %v904_v22 = vpop.f32.mrf.mxu0 }
 0x971   :  { %v2781_v23 = vadd.f32 %v904_v22, %v2727_v20 }
 0x972   :  { %v906_v24 = vpop.f32.mrf.mxu0 }
 0x973   :  { %v907_v25 = vadd.f32 %v906_v24, %v2729_v21  ;;  %v988_v28 = vrot.slane %v2781_v23, 4 }
 0x974   :  { %v908_v30 = vpop.f32.mrf.mxu0 }
 0x975   :  { %v1000_v31 = vrot.slane %v907_v25, 4  ;;  %989 = vrot.lane.b32.xlu1 %v988_v28, %s2452_s25 }
 0x976   :  { %v909_v32 = vpop.f32.mrf.mxu0 }
 0x977   :  { %1011 = vrot.lane.b32.xlu0 %v1000_v31, %s2451_s16 }
 0x97b   :  { %1001 = vrot.lane.b32.xlu0 %v1000_v31, %s2452_s25 }
 0x9ab   :  { %v757_v17 = vpop.permute.xlu0 %756 }
 0x9ac   :  { %2166 = vmatmul.mubr.msk.bf16.vlgmr.msra.gmra.mxu1 %vm680_vm15, %v757_v17 }
 0x9ad   :  { %2170 = vmatpush3.bf16.msra.mxu1 %v2764_v2  ;;  %2173 = vmatprep.mubr.msk.bf16.mxu1 %vm2449_vm8, %v2448_v26 }
 0x9ae   :  { %2171 = vmatprep.subr.bf16.mxu1 %v2448_v26 }
 0x9b1   :  { %2172 = vmatpush3.bf16.msra.mxu1 %v2770_v15 }
 0x9b2   :  { %2177 = vmatprep.subr.bf16.mxu1 %v2448_v26 }
 0x9e7   :  { %v990_v33 = vpop.permute.xlu1 %989 }
 0x9e8   :  { %v992_v34 = vadd.f32 %v990_v33, %v2683_v42 }
 0x9e9   :  { %v1012_v39 = vpop.permute.xlu0 %1011 }
 0x9ea   :  { %v2087_v29 = vmul.f32 -1.442695, %v992_v34 }
 0x9ec   :  { %2271 = vpow2.f32 %v2087_v29 }
 0x9ed   :  { %v1002_v60 = vpop.permute.xlu0 %1001 }
 0x9ee   :  { %v1004_v62 = vadd.f32 %v1002_v60, %v2683_v42 }
 0x9f0   :  { %v2088_v1 = vmul.f32 -1.442695, %v1004_v62 }
 0x9f9   :  { %v2272_v35 = vpop.eup %2271 }
 0x9fa   :  { %v996_v36 = vadd.f32 1.0, %v2272_v35 }
 0x9fc   :  { %2273 = vrcp.f32 %v996_v36 }
 0xa09   :  { %v2274_v37 = vpop.eup %2273 }
 0xa0a   :  { %v1014_v40 = vmul.f32 %v2274_v37, %v1012_v39 }
 0xa0c   :  { %1016 = vrot.lane.b32.xlu1 %v1014_v40, %s2450_s15 }
 0xa6c   :  { %v807_v44 = vpop.f32.mrf.mxu1 }
 0xa6d   :  { %v808_v38 = vadd.f32 %v2740_v48, %v807_v44 }
 0xa6e   :  { %v2167_v45 = vpop.f32.mrf.mxu1 }
 0xa6f   :  { %919 = vrot.lane.b32.xlu0 %v808_v38, %s2450_s15  ;;  %v911_v56 = vadd.f32 %v2781_v23, %v808_v38 }
 0xa70   :  { %v810_v46 = vpop.f32.mrf.mxu1 }
 0xa71   :  { %v2085_v41 = vmul.f32 -1.442695, %v911_v56 }
 0xa72   :  { %v2168_v47 = vpop.f32.mrf.mxu1 }
 0xa7e   :  { %v1017_v49 = vpop.permute.xlu1 %1016 }
 0xa7f   :  { %v1019_v50 = vadd.f32 %v1017_v49, %v2683_v42 }
 0xa81   :  { %2275 = vtanh.f32 %v1019_v50 }
 0xa82   :  { %2277 = vpow2.f32 %v2085_v41 }
 0xa8e   :  { %v2276_v51 = vpop.eup %2275 }
 0xa8f   :  { %v1022_v52 = vrot.slane %v2276_v51, 2  ;;  %v2278_v58 = vpop.eup %2277 }
 0xa90   :  { %v915_v59 = vadd.f32 1.0, %v2278_v58 }
 0xa91   :  { %v1024_v53 = vsub.f32 %v2748_v3, %v1022_v52 }
 0xa92   :  { %2279 = vrcp.f32 %v915_v59 }
 0xa93   :  { %v1026_v54 = vrot.slane %v1024_v53, 6  ;;  %2281 = vpow2.f32 %v2088_v1 }
 0xa95   :  { %1027 = vrot.lane.b32.xlu1 %v1026_v54, %s2451_s16 }
 0xa9f   :  { %v2280_v57 = vpop.eup %2279 }
 0xaa0   :  { %v2282_v3 = vpop.eup %2281 }
 0xaa1   :  { %v1008_v4 = vadd.f32 1.0, %v2282_v3 }
 0xaa3   :  { %2283 = vrcp.f32 %v1008_v4 }
 0xab0   :  { %v2284_v5 = vpop.eup %2283 }
 0xae1   :  { %v920_v63 = vpop.permute.xlu0 %919 }
 0xae2   :  { %v922_v55 = vmul.f32 %v2280_v57, %v920_v63 }
 0xae4   :  { %924 = vrot.lane.b32.xlu0 %v922_v55, %s2450_s15 }
 0xb07   :  { %v1028_v6 = vpop.permute.xlu1 %1027 }
 0xb08   :  { %v1030_v7 = vmul.f32 %v2284_v5, %v1028_v6 }
 0xb0a   :  { %1032 = vrot.lane.b32.xlu1 %v1030_v7, %s2452_s25 }
 0xb56   :  { %v925_v27 = vpop.permute.xlu0 %924 }
 0xb57   :  { %v927_v11 = vadd.f32 %v925_v27, %v2781_v23 }
 0xb59   :  { %2285 = vtanh.f32 %v927_v11 }
 0xb66   :  { %v2286_v12 = vpop.eup %2285 }
 0xb67   :  { %v929_v13 = vsub.f32 %v2775_v18, %v2286_v12 }
 0xb69   :  { %931 = vrot.lane.b32.xlu0 %v929_v13, %s2451_s16 }
 0xb7c   :  { %v1033_v14 = vpop.permute.xlu1 %1032 }
 0xb7d   :  { %v1035_v16 = vadd.f32 %v2276_v51, %v1033_v14 }
 0xb7f   :  { %v1036_v19 = vpack.c.bf16 %v1035_v16, %v1035_v16 }
 0xb81   :  { %v1038_v22 = vrot.slane %v1036_v19, 2 }
 0xb83   :  { %1039 = vrot.lane.b32.xlu1 %v1038_v22, %s2450_s15 }
 0xbdb   :  { %v932_v24 = vpop.permute.xlu0 %931 }
 0xbdc   :  { %v934_v25 = vmul.f32 %v2280_v57, %v932_v24 }
 0xbde   :  { %936 = vrot.lane.b32.xlu1 %v934_v25, %s2452_s25 }
 0xbf5   :  { %v1040_v28 = vpop.permute.xlu1 %1039 }
 0xbf6   :  { %2089 = vmatmul.mubr.msk.bf16.vlgmr.msra.gmra.mxu0 %vm680_vm15, %v1040_v28 }
 0xbf7   :  { %1231 = vmatpush1.bf16.msra.mxu0 %v2700_v8  ;;  %1250 = vmatprep.mubr.bf16.mxu0 %v2445_v0 }
 0xbf8   :  { %1232 = vmatprep.subr.bf16.mxu0 %v2705_v9 }
 0xbfb   :  { %1233 = vmatpush1.bf16.msra.mxu0 %v2712_v10 }
 0xbfc   :  { %1401 = vmatprep.subr.bf16.mxu0 %v2695_v43 }
 0xc50   :  { %v937_v18 = vpop.permute.xlu1 %936 }
 0xc51   :  { %v2817_v23 = vadd.f32 %v2286_v12, %v937_v18 }
 0xc53   :  { %v940_v30 = vpack.c.bf16 %v2817_v23, %v2817_v23 }
 0xc55   :  { %942 = vrot.lane.b32.xlu0 %v940_v30, %s2450_s15 }
 0xcb6   :  { %v1078_v31 = vpop.f32.mrf.mxu0 }
 0xcb7   :  { %v2823_v32 = vadd.f32 %v1078_v31, %v2727_v20 }
 0xcb8   :  { %v1080_v17 = vpop.f32.mrf.mxu0 }
 0xcb9   :  { %v1081_v33 = vadd.f32 %v1080_v17, %v2729_v21  ;;  %v1162_v34 = vrot.slane %v2823_v32, 2 }
 0xcba   :  { %v1082_v29 = vpop.f32.mrf.mxu0 }
 0xcbb   :  { %v1174_v35 = vrot.slane %v1081_v33, 2  ;;  %1163 = vrot.lane.b32.xlu1 %v1162_v34, %s2452_s25 }
 0xcbc   :  { %v1083_v36 = vpop.f32.mrf.mxu0 }
 0xcbd   :  { %1185 = vrot.lane.b32.xlu0 %v1174_v35, %s2451_s16 }
 0xcc1   :  { %1175 = vrot.lane.b32.xlu0 %v1174_v35, %s2452_s25 }
 0xcc7   :  { %v943_v37 = vpop.permute.xlu0 %942 }
 0xcc8   :  { %2174 = vmatmul.mubr.msk.bf16.vlgmr.msra.gmra.mxu1 %vm680_vm15, %v943_v37 }
 0xcc9   :  { %2178 = vmatpush3.bf16.msra.mxu1 %v2764_v2  ;;  %2181 = vmatprep.mubr.msk.bf16.mxu1 %vm2449_vm8, %v2448_v26 }
 0xcca   :  { %2179 = vmatprep.subr.bf16.mxu1 %v2448_v26 }
 0xccd   :  { %2180 = vmatpush3.bf16.msra.mxu1 %v2770_v15 }
 0xcce   :  { %2185 = vmatprep.subr.bf16.mxu1 %v2448_v26 }
 0xd2d   :  { %v1164_v39 = vpop.permute.xlu1 %1163 }
 0xd2e   :  { %v1166_v40 = vadd.f32 %v1164_v39, %v2683_v42 }
 0xd2f   :  { %v1186_v47 = vpop.permute.xlu0 %1185 }
 0xd30   :  { %v2092_v44 = vmul.f32 -1.442695, %v1166_v40 }
 0xd32   :  { %2287 = vpow2.f32 %v2092_v44 }
 0xd33   :  { %v1176_v3 = vpop.permute.xlu0 %1175 }
 0xd34   :  { %v1178_v7 = vadd.f32 %v1176_v3, %v2683_v42 }
 0xd36   :  { %v2093_v27 = vmul.f32 -1.442695, %v1178_v7 }
 0xd3f   :  { %v2288_v38 = vpop.eup %2287 }
 0xd40   :  { %v1170_v45 = vadd.f32 1.0, %v2288_v38 }
 0xd42   :  { %2289 = vrcp.f32 %v1170_v45 }
 0xd4f   :  { %v2290_v46 = vpop.eup %2289 }
 0xd50   :  { %v1188_v49 = vmul.f32 %v2290_v46, %v1186_v47 }
 0xd52   :  { %1190 = vrot.lane.b32.xlu1 %v1188_v49, %s2450_s15 }
 0xd88   :  { %v981_v50 = vpop.f32.mrf.mxu1 }
 0xd89   :  { %v982_v51 = vadd.f32 %v2740_v48, %v981_v50 }
 0xd8a   :  { %v2175_v52 = vpop.f32.mrf.mxu1 }
 0xd8b   :  { %1093 = vrot.lane.b32.xlu0 %v982_v51, %s2450_s15  ;;  %v1085_v59 = vadd.f32 %v2823_v32, %v982_v51 }
 0xd8c   :  { %v984_v53 = vpop.f32.mrf.mxu1 }
 0xd8d   :  { %v2090_v57 = vmul.f32 -1.442695, %v1085_v59 }
 0xd8e   :  { %v2176_v54 = vpop.f32.mrf.mxu1 }
 0xdc4   :  { %v1191_v56 = vpop.permute.xlu1 %1190 }
 0xdc5   :  { %v1193_v41 = vadd.f32 %v1191_v56, %v2683_v42 }
 0xdc7   :  { %2291 = vtanh.f32 %v1193_v41 }
 0xdc8   :  { %2293 = vpow2.f32 %v2090_v57 }
 0xdd4   :  { %v2292_v58 = vpop.eup %2291 }
 0xdd5   :  { %v1196_v60 = vrot.slane %v2292_v58, 2  ;;  %v2294_v1 = vpop.eup %2293 }
 0xdd6   :  { %v1089_v55 = vadd.f32 1.0, %v2294_v1 }
 0xdd7   :  { %v1198_v62 = vsub.f32 %v1035_v16, %v1196_v60 }
 0xdd8   :  { %2295 = vrcp.f32 %v1089_v55 }
 0xdd9   :  { %v1200_v63 = vrot.slane %v1198_v62, 6  ;;  %2297 = vpow2.f32 %v2093_v27 }
 0xddb   :  { %1201 = vrot.lane.b32.xlu1 %v1200_v63, %s2451_s16 }
 0xde5   :  { %v2296_v4 = vpop.eup %2295 }
 0xde6   :  { %v2298_v11 = vpop.eup %2297 }
 0xde7   :  { %v1182_v12 = vadd.f32 1.0, %v2298_v11 }
 0xde9   :  { %2299 = vrcp.f32 %v1182_v12 }
 0xdf6   :  { %v2300_v13 = vpop.eup %2299 }
 0xdfd   :  { %v1094_v5 = vpop.permute.xlu0 %1093 }
 0xdfe   :  { %v1096_v6 = vmul.f32 %v2296_v4, %v1094_v5 }
 0xe00   :  { %1098 = vrot.lane.b32.xlu0 %v1096_v6, %s2450_s15 }
 0xe4d   :  { %v1202_v14 = vpop.permute.xlu1 %1201 }
 0xe4e   :  { %v1204_v16 = vmul.f32 %v2300_v13, %v1202_v14 }
 0xe50   :  { %1206 = vrot.lane.b32.xlu1 %v1204_v16, %s2452_s25 }
 0xe72   :  { %v1099_v19 = vpop.permute.xlu0 %1098 }
 0xe73   :  { %v1101_v22 = vadd.f32 %v1099_v19, %v2823_v32 }
 0xe75   :  { %2301 = vtanh.f32 %v1101_v22 }
 0xe82   :  { %v2302_v24 = vpop.eup %2301 }
 0xe83   :  { %v1103_v25 = vsub.f32 %v2817_v23, %v2302_v24 }
 0xe85   :  { %1105 = vrot.lane.b32.xlu0 %v1103_v25, %s2451_s16 }
 0xec2   :  { %v1207_v42 = vpop.permute.xlu1 %1206 }
 0xec3   :  { %v2850_v28 = vadd.f32 %v2292_v58, %v1207_v42 }
 0xec5   :  { %v1210_v18 = vpack.c.bf16 %v2850_v28, %v2850_v28 }
 0xec7   :  { %v1212_v30 = vrot.slane %v1210_v18, 3 }
 0xec9   :  { %1213 = vrot.lane.b32.xlu1 %v1212_v30, %s2450_s15 }
 0xef7   :  { %v1106_v31 = vpop.permute.xlu0 %1105 }
 0xef8   :  { %v1108_v17 = vmul.f32 %v2296_v4, %v1106_v31 }
 0xefa   :  { %1110 = vrot.lane.b32.xlu1 %v1108_v17, %s2452_s25 }
 0xf3b   :  { %v1214_v32 = vpop.permute.xlu1 %1213 }
 0xf3c   :  { %2094 = vmatmul.mubr.msk.bf16.vlgmr.msra.gmra.mxu0 %vm680_vm15, %v1214_v32 }
 0xf3d   :  { %1402 = vmatpush1.bf16.msra.mxu0 %v2700_v8  ;;  %1421 = vmatprep.mubr.bf16.mxu0 %v2445_v0 }
 0xf3e   :  { %1403 = vmatprep.subr.bf16.mxu0 %v2705_v9 }
 0xf41   :  { %1404 = vmatpush1.bf16.msra.mxu0 %v2712_v10 }
 0xf42   :  { %1575 = vmatprep.subr.bf16.mxu0 %v2695_v43 }
 0xf6c   :  { %v1111_v23 = vpop.permute.xlu1 %1110 }
 0xf6d   :  { %v2862_v33 = vadd.f32 %v2302_v24, %v1111_v23 }
 0xf6f   :  { %v1114_v34 = vpack.c.bf16 %v2862_v33, %v2862_v33 }
 0xf71   :  { %1116 = vrot.lane.b32.xlu0 %v1114_v34, %s2450_s15 }
 0xfe3   :  { %v1117_v29 = vpop.permute.xlu0 %1116 }
 0xfe4   :  { %2182 = vmatmul.mubr.msk.bf16.vlgmr.msra.gmra.mxu1 %vm680_vm15, %v1117_v29 }
 0xfe5   :  { %2186 = vmatpush3.bf16.msra.mxu1 %v2764_v2  ;;  %2189 = vmatprep.mubr.msk.bf16.mxu1 %vm2449_vm8, %v2448_v26 }
 0xfe6   :  { %2187 = vmatprep.subr.bf16.mxu1 %v2448_v26 }
 0xfe9   :  { %2188 = vmatpush3.bf16.msra.mxu1 %v2770_v15 }
 0xfea   :  { %2193 = vmatprep.subr.bf16.mxu1 %v2448_v26 }
 0xffc   :  { %v1252_v35 = vpop.f32.mrf.mxu0 }
 0xffd   :  { %v1253_v36 = vadd.f32 %v1252_v35, %v2727_v20 }
 0xffe   :  { %v1254_v37 = vpop.f32.mrf.mxu0 }
 0xfff   :  { %v1255_v39 = vadd.f32 %v1254_v37, %v2729_v21  ;;  %1336 = vrot.lane.b32.xlu1 %v1253_v36, %s2452_s25 }
0x1000   :  { %v1256_v40 = vpop.f32.mrf.mxu0 }
0x1001   :  { %1357 = vrot.lane.b32.xlu0 %v1255_v39, %s2451_s16 }
0x1002   :  { %v1257_v44 = vpop.f32.mrf.mxu0 }
0x1071   :  { %v1337_v38 = vpop.permute.xlu1 %1336 }
0x1072   :  { %v1339_v45 = vadd.f32 %v1337_v38, %v2687_v61 }
0x1073   :  { %v1358_v51 = vpop.permute.xlu0 %1357 }
0x1074   :  { %v2097_v46 = vmul.f32 -1.442695, %v1339_v45 }
0x1076   :  { %2303 = vpow2.f32 %v2097_v46 }
0x1083   :  { %v2304_v47 = vpop.eup %2303 }
0x1084   :  { %v1343_v49 = vadd.f32 1.0, %v2304_v47 }
0x1086   :  { %2305 = vrcp.f32 %v1343_v49 }
0x1093   :  { %v2306_v50 = vpop.eup %2305 }
0x1094   :  { %v1360_v52 = vmul.f32 %v2306_v50, %v1358_v51 }
0x1096   :  { %1362 = vrot.lane.b32.xlu1 %v1360_v52, %s2450_s15 }
0x109a   :  { %1347 = vrot.lane.b32.xlu1 %v1255_v39, %s2452_s25 }
0x10a4   :  { %v1155_v53 = vpop.f32.mrf.mxu1 }
0x10a5   :  { %v1156_v54 = vadd.f32 %v2740_v48, %v1155_v53 }
0x10a6   :  { %v2183_v56 = vpop.f32.mrf.mxu1 }
0x10a7   :  { %1267 = vrot.lane.b32.xlu0 %v1156_v54, %s2450_s15  ;;  %v1259_v59 = vadd.f32 %v1253_v36, %v1156_v54 }
0x10a8   :  { %v1158_v41 = vpop.f32.mrf.mxu1 }
0x10a9   :  { %v2095_v60 = vmul.f32 -1.442695, %v1259_v59 }
0x10aa   :  { %v2184_v58 = vpop.f32.mrf.mxu1 }
0x10ab   :  { %2307 = vpow2.f32 %v2095_v60 }
0x10b8   :  { %v2308_v62 = vpop.eup %2307 }
0x10b9   :  { %v1263_v57 = vadd.f32 1.0, %v2308_v62 }
0x1108   :  { %v1363_v63 = vpop.permute.xlu1 %1362 }
0x1109   :  { %v1365_v1 = vadd.f32 %v1363_v63, %v2687_v61 }
0x110b   :  { %2309 = vtanh.f32 %v1365_v1 }
0x110c   :  { %2311 = vrcp.f32 %v1263_v57  ;;  %v1348_v11 = vpop.permute.xlu1 %1347 }
0x110d   :  { %v1350_v12 = vadd.f32 %v1348_v11, %v2687_v61 }
0x110f   :  { %v2098_v13 = vmul.f32 -1.442695, %v1350_v12 }
0x1111   :  { %2313 = vpow2.f32 %v2098_v13 }
0x1118   :  { %v2310_v55 = vpop.eup %2309 }
0x1119   :  { %v2312_v3 = vpop.eup %2311  ;;  %v1268_v4 = vpop.permute.xlu0 %1267  ;;  %v1368_v5 = vrot.slane %v2310_v55, 2 }
0x111a   :  { %v1270_v6 = vmul.f32 %v2312_v3, %v1268_v4 }
0x111b   :  { %v1370_v7 = vsub.f32 %v2850_v28, %v1368_v5 }
0x111c   :  { %1272 = vrot.lane.b32.xlu1 %v1270_v6, %s2450_s15 }
0x111d   :  { %v1372_v27 = vrot.slane %v1370_v7, 6 }
0x111e   :  { %v2314_v14 = vpop.eup %2313 }
0x111f   :  { %1373 = vrot.lane.b32.xlu0 %v1372_v27, %s2451_s16  ;;  %v1354_v16 = vadd.f32 1.0, %v2314_v14 }
0x1121   :  { %2315 = vrcp.f32 %v1354_v16 }
0x112e   :  { %v2316_v24 = vpop.eup %2315 }
0x118e   :  { %v1273_v19 = vpop.permute.xlu1 %1272 }
0x118f   :  { %v1275_v22 = vadd.f32 %v1273_v19, %v1253_v36 }
0x1191   :  { %2317 = vtanh.f32 %v1275_v22  ;;  %v1374_v25 = vpop.permute.xlu0 %1373 }
0x1192   :  { %v1376_v42 = vmul.f32 %v2316_v24, %v1374_v25 }
0x1194   :  { %1378 = vrot.lane.b32.xlu0 %v1376_v42, %s2452_s25 }
0x119e   :  { %v2318_v28 = vpop.eup %2317 }
0x119f   :  { %v1277_v18 = vsub.f32 %v2862_v33, %v2318_v28 }
0x11a1   :  { %1279 = vrot.lane.b32.xlu1 %v1277_v18, %s2451_s16 }
0x1206   :  { %v1379_v30 = vpop.permute.xlu0 %1378 }
0x1207   :  { %v2891_v31 = vadd.f32 %v2310_v55, %v1379_v30 }
0x1209   :  { %v1382_v17 = vpack.c.bf16 %v2891_v31, %v2891_v31 }
0x120b   :  { %1384 = vrot.lane.b32.xlu0 %v1382_v17, %s2450_s15 }
0x1213   :  { %v1280_v32 = vpop.permute.xlu1 %1279 }
0x1214   :  { %v1282_v23 = vmul.f32 %v2312_v3, %v1280_v32 }
0x1216   :  { %1284 = vrot.lane.b32.xlu1 %v1282_v23, %s2452_s25 }
0x127d   :  { %v1385_v34 = vpop.permute.xlu0 %1384 }
0x127e   :  { %2099 = vmatmul.mubr.msk.bf16.vlgmr.msra.gmra.mxu0 %vm680_vm15, %v1385_v34 }
0x127f   :  { %1576 = vmatpush1.bf16.msra.mxu0 %v2700_v8  ;;  %1595 = vmatprep.mubr.bf16.mxu0 %v2445_v0 }
0x1280   :  { %1577 = vmatprep.subr.bf16.mxu0 %v2705_v9 }
0x1283   :  { %1578 = vmatpush1.bf16.msra.mxu0 %v2712_v10 }
0x1284   :  { %1749 = vmatprep.subr.bf16.mxu0 %v2695_v43 }
0x1288   :  { %v1285_v33 = vpop.permute.xlu1 %1284 }
0x1289   :  { %v2903_v29 = vadd.f32 %v2318_v28, %v1285_v33 }
0x128b   :  { %v1288_v35 = vpack.c.bf16 %v2903_v29, %v2903_v29 }
0x128d   :  { %1290 = vrot.lane.b32.xlu0 %v1288_v35, %s2450_s15 }
0x12ff   :  { %v1291_v36 = vpop.permute.xlu0 %1290 }
0x1300   :  { %2190 = vmatmul.mubr.msk.bf16.vlgmr.msra.gmra.mxu1 %vm680_vm15, %v1291_v36 }
0x1301   :  { %2194 = vmatpush3.bf16.msra.mxu1 %v2764_v2  ;;  %2197 = vmatprep.mubr.msk.bf16.mxu1 %vm2449_vm8, %v2448_v26 }
0x1302   :  { %2195 = vmatprep.subr.bf16.mxu1 %v2448_v26 }
0x1305   :  { %2196 = vmatpush3.bf16.msra.mxu1 %v2770_v15 }
0x1306   :  { %2201 = vmatprep.subr.bf16.mxu1 %v2448_v26 }
0x133e   :  { %v1423_v37 = vpop.f32.mrf.mxu0 }
0x133f   :  { %v1424_v39 = vadd.f32 %v1423_v37, %v2727_v20 }
0x1340   :  { %v1425_v40 = vpop.f32.mrf.mxu0 }
0x1341   :  { %v1426_v44 = vadd.f32 %v1425_v40, %v2729_v21  ;;  %v1507_v38 = vrot.slane %v1424_v39, 6 }
0x1342   :  { %v1427_v45 = vpop.f32.mrf.mxu0 }
0x1343   :  { %v1519_v46 = vrot.slane %v1426_v44, 6  ;;  %1508 = vrot.lane.b32.xlu1 %v1507_v38, %s2452_s25 }
0x1344   :  { %v1428_v47 = vpop.f32.mrf.mxu0 }
0x1345   :  { %1530 = vrot.lane.b32.xlu0 %v1519_v46, %s2451_s16 }
0x13b5   :  { %v1509_v49 = vpop.permute.xlu1 %1508 }
0x13b6   :  { %v1511_v50 = vadd.f32 %v1509_v49, %v2687_v61 }
0x13b7   :  { %v1531_v62 = vpop.permute.xlu0 %1530 }
0x13b8   :  { %v2102_v51 = vmul.f32 -1.442695, %v1511_v50 }
0x13ba   :  { %2319 = vpow2.f32 %v2102_v51 }
0x13c0   :  { %v1329_v52 = vpop.f32.mrf.mxu1 }
0x13c1   :  { %v1330_v53 = vadd.f32 %v2740_v48, %v1329_v52 }
0x13c2   :  { %v2191_v54 = vpop.f32.mrf.mxu1 }
0x13c3   :  { %1438 = vrot.lane.b32.xlu0 %v1330_v53, %s2450_s15  ;;  %v1430_v63 = vadd.f32 %v1424_v39, %v1330_v53 }
0x13c4   :  { %v1332_v56 = vpop.f32.mrf.mxu1 }
0x13c5   :  { %v2100_v1 = vmul.f32 -1.442695, %v1430_v63 }
0x13c6   :  { %v2192_v41 = vpop.f32.mrf.mxu1 }
0x13c7   :  { %v2320_v58 = vpop.eup %2319 }
0x13c8   :  { %v1515_v59 = vadd.f32 1.0, %v2320_v58 }
0x13ca   :  { %2321 = vrcp.f32 %v1515_v59 }
0x13cb   :  { %2323 = vpow2.f32 %v2100_v1 }
0x13d7   :  { %v2322_v60 = vpop.eup %2321 }
0x13d8   :  { %v1533_v57 = vmul.f32 %v2322_v60, %v1531_v62  ;;  %v2324_v55 = vpop.eup %2323 }
0x13d9   :  { %v1434_v3 = vadd.f32 1.0, %v2324_v55 }
0x13da   :  { %1535 = vrot.lane.b32.xlu1 %v1533_v57, %s2450_s15 }
0x13db   :  { %2325 = vrcp.f32 %v1434_v3 }
0x13de   :  { %1520 = vrot.lane.b32.xlu1 %v1519_v46, %s2452_s25 }
0x13e8   :  { %v2326_v4 = vpop.eup %2325 }
0x1435   :  { %v1439_v5 = vpop.permute.xlu0 %1438 }
0x1436   :  { %v1441_v6 = vmul.f32 %v2326_v4, %v1439_v5 }
0x1438   :  { %1443 = vrot.lane.b32.xlu0 %v1441_v6, %s2450_s15 }
0x144c   :  { %v1536_v7 = vpop.permute.xlu1 %1535 }
0x144d   :  { %v1538_v27 = vadd.f32 %v1536_v7, %v2687_v61 }
0x144f   :  { %2327 = vtanh.f32 %v1538_v27 }
0x1450   :  { %v1521_v16 = vpop.permute.xlu1 %1520 }
0x1451   :  { %v1523_v24 = vadd.f32 %v1521_v16, %v2687_v61 }
0x1453   :  { %v2103_v25 = vmul.f32 -1.442695, %v1523_v24 }
0x145c   :  { %v2328_v11 = vpop.eup %2327 }
0x145d   :  { %v1541_v12 = vrot.slane %v2328_v11, 2 }
0x145f   :  { %v1543_v13 = vsub.f32 %v2891_v31, %v1541_v12 }
0x1461   :  { %v1545_v14 = vrot.slane %v1543_v13, 6 }
0x1463   :  { %1546 = vrot.lane.b32.xlu1 %v1545_v14, %s2451_s16 }
0x14aa   :  { %v1444_v19 = vpop.permute.xlu0 %1443 }
0x14ab   :  { %v1446_v22 = vadd.f32 %v1444_v19, %v1424_v39 }
0x14ad   :  { %2329 = vtanh.f32 %v1446_v22 }
0x14ae   :  { %2331 = vpow2.f32 %v2103_v25 }
0x14ba   :  { %v2330_v42 = vpop.eup %2329 }
0x14bb   :  { %v1448_v28 = vsub.f32 %v2903_v29, %v2330_v42  ;;  %v2332_v18 = vpop.eup %2331 }
0x14bc   :  { %v1527_v30 = vadd.f32 1.0, %v2332_v18 }
0x14bd   :  { %1450 = vrot.lane.b32.xlu1 %v1448_v28, %s2451_s16 }
0x14be   :  { %2333 = vrcp.f32 %v1527_v30 }
0x14cb   :  { %v2334_v31 = vpop.eup %2333 }
0x14d5   :  { %v1547_v17 = vpop.permute.xlu1 %1546 }
0x14d6   :  { %v1549_v32 = vmul.f32 %v2334_v31, %v1547_v17 }
0x14d8   :  { %1551 = vrot.lane.b32.xlu0 %v1549_v32, %s2452_s25 }
0x152f   :  { %v1451_v23 = vpop.permute.xlu1 %1450 }
0x1530   :  { %v1453_v34 = vmul.f32 %v2326_v4, %v1451_v23 }
0x1532   :  { %1455 = vrot.lane.b32.xlu0 %v1453_v34, %s2452_s25 }
0x154a   :  { %v1552_v33 = vpop.permute.xlu0 %1551 }
0x154b   :  { %v2933_v35 = vadd.f32 %v2328_v11, %v1552_v33 }
0x154d   :  { %v1555_v29 = vpack.c.bf16 %v2933_v35, %v2933_v35 }
0x154f   :  { %v1557_v36 = vrot.slane %v1555_v29, 1 }
0x1551   :  { %1558 = vrot.lane.b32.xlu1 %v1557_v36, %s2450_s15 }
0x15a4   :  { %v1456_v37 = vpop.permute.xlu0 %1455 }
0x15a5   :  { %v2938_v39 = vadd.f32 %v2330_v42, %v1456_v37 }
0x15a7   :  { %v1459_v40 = vpack.c.bf16 %v2938_v39, %v2938_v39 }
0x15a9   :  { %1461 = vrot.lane.b32.xlu0 %v1459_v40, %s2450_s15 }
0x15c3   :  { %v1559_v44 = vpop.permute.xlu1 %1558 }
0x15c4   :  { %2104 = vmatmul.mubr.msk.bf16.vlgmr.msra.gmra.mxu0 %vm680_vm15, %v1559_v44 }
0x15c5   :  { %1750 = vmatpush1.bf16.msra.mxu0 %v2700_v8  ;;  %1769 = vmatprep.mubr.bf16.mxu0 %v2445_v0 }
0x15c6   :  { %1751 = vmatprep.subr.bf16.mxu0 %v2705_v9 }
0x15c9   :  { %1752 = vmatpush1.bf16.msra.mxu0 %v2712_v10 }
0x15ca   :  { %1923 = vmatprep.subr.bf16.mxu0 %v2695_v43 }
0x161b   :  { %v1462_v38 = vpop.permute.xlu0 %1461 }
0x161c   :  { %2198 = vmatmul.mubr.msk.bf16.vlgmr.msra.gmra.mxu1 %vm680_vm15, %v1462_v38  ;;  %v2373_v38 = vld [vmem:[%s3049_s3 + $0x20] ss:$16 sps:$4 sm:$0xff]  }
0x161d   :  { %2202 = vmatpush3.bf16.msra.mxu1 %v2764_v2  ;;  %2205 = vmatprep.mubr.msk.bf16.mxu1 %vm2449_vm8, %v2448_v26 }
0x161e   :  { %2203 = vmatprep.subr.bf16.mxu1 %v2448_v26 }
0x1621   :  { %2204 = vmatpush3.bf16.msra.mxu1 %v2770_v15 }
0x1622   :  { %2209 = vmatprep.subr.bf16.mxu1 %v2448_v26 }
0x1684   :  { %v1597_v8 = vpop.f32.mrf.mxu0 }
0x1685   :  { %v1598_v9 = vadd.f32 %v1597_v8, %v2727_v20  ;;  %v2374_v8 = vld [vmem:[%s3049_s3 + $0x4] ss:$16 sps:$4 sm:$0xff]  }
0x1686   :  { %v1599_v10 = vpop.f32.mrf.mxu0 }
0x1687   :  { %v1600_v43 = vadd.f32 %v1599_v10, %v2729_v21  ;;  %v1681_v45 = vrot.slane %v1598_v9, 4 }
0x1688   :  { %v1601_v46 = vpop.f32.mrf.mxu0 }
0x1689   :  { %v1693_v47 = vrot.slane %v1600_v43, 4  ;;  %1682 = vrot.lane.b32.xlu1 %v1681_v45, %s2452_s25 }
0x168a   :  { %v1602_v49 = vpop.f32.mrf.mxu0 }
0x168b   :  { %1704 = vrot.lane.b32.xlu0 %v1693_v47, %s2451_s16 }
0x16dc   :  { %v1500_v50 = vpop.f32.mrf.mxu1 }
0x16dd   :  { %v1501_v51 = vadd.f32 %v2740_v48, %v1500_v50 }
0x16de   :  { %v2199_v52 = vpop.f32.mrf.mxu1 }
0x16df   :  { %1612 = vrot.lane.b32.xlu1 %v1501_v51, %s2450_s15  ;;  %v1604_v48 = vadd.f32 %v1598_v9, %v1501_v51  ;;  %v3006_v52 = vld [vmem:[#allocation4 + $0x7] ss:$0 sm:$0xff] }
0x16e0   :  { %v1503_v53 = vpop.f32.mrf.mxu1 }
0x16e1   :  { %v2105_v1 = vmul.f32 -1.442695, %v1604_v48 }
0x16e2   :  { %v2200_v54 = vpop.f32.mrf.mxu1 }
0x16fb   :  { %v1683_v56 = vpop.permute.xlu1 %1682 }
0x16fc   :  { %v1685_v41 = vadd.f32 %v1683_v56, %v2687_v61 }
0x16fd   :  { %v1705_v57 = vpop.permute.xlu0 %1704 }
0x16fe   :  { %v2107_v58 = vmul.f32 -1.442695, %v1685_v41 }
0x1700   :  { %2335 = vpow2.f32 %v2107_v58 }
0x170d   :  { %v2336_v59 = vpop.eup %2335 }
0x170e   :  { %v1689_v60 = vadd.f32 1.0, %v2336_v59 }
0x1710   :  { %2337 = vrcp.f32 %v1689_v60 }
0x1711   :  { %2339 = vpow2.f32 %v2105_v1 }
0x171d   :  { %v2338_v62 = vpop.eup %2337 }
0x171e   :  { %v1707_v63 = vmul.f32 %v2338_v62, %v1705_v57  ;;  %v2340_v55 = vpop.eup %2339 }
0x171f   :  { %v1608_v3 = vadd.f32 1.0, %v2340_v55 }
0x1720   :  { %1709 = vrot.lane.b32.xlu0 %v1707_v63, %s2450_s15 }
0x1721   :  { %2341 = vrcp.f32 %v1608_v3 }
0x1724   :  { %1694 = vrot.lane.b32.xlu0 %v1693_v47, %s2452_s25 }
0x172e   :  { %v2342_v4 = vpop.eup %2341 }
0x1751   :  { %v1613_v5 = vpop.permute.xlu1 %1612 }
0x1752   :  { %v1615_v6 = vmul.f32 %v2342_v4, %v1613_v5 }
0x1754   :  { %1617 = vrot.lane.b32.xlu1 %v1615_v6, %s2450_s15 }
0x1792   :  { %v1710_v7 = vpop.permute.xlu0 %1709 }
0x1793   :  { %v1712_v27 = vadd.f32 %v1710_v7, %v2687_v61 }
0x1795   :  { %2343 = vtanh.f32 %v1712_v27 }
0x1796   :  { %v1695_v25 = vpop.permute.xlu0 %1694 }
0x1797   :  { %v1697_v42 = vadd.f32 %v1695_v25, %v2687_v61 }
0x1799   :  { %v2108_v28 = vmul.f32 -1.442695, %v1697_v42 }
0x17a2   :  { %v2344_v11 = vpop.eup %2343 }
0x17a3   :  { %v1715_v12 = vrot.slane %v2344_v11, 2 }
0x17a5   :  { %v1717_v13 = vsub.f32 %v2933_v35, %v1715_v12 }
0x17a7   :  { %v1719_v14 = vrot.slane %v1717_v13, 6 }
0x17a9   :  { %1720 = vrot.lane.b32.xlu1 %v1719_v14, %s2451_s16 }
0x17c6   :  { %v1618_v16 = vpop.permute.xlu1 %1617 }
0x17c7   :  { %v1620_v19 = vadd.f32 %v1618_v16, %v1598_v9  ;;  %v2375_v9 = vld [vmem:[%s3049_s3] ss:$16 sps:$4 sm:$0xff]  }
0x17c9   :  { %2345 = vtanh.f32 %v1620_v19 }
0x17ca   :  { %2347 = vpow2.f32 %v2108_v28 }
0x17d6   :  { %v2346_v22 = vpop.eup %2345 }
0x17d7   :  { %v1622_v24 = vsub.f32 %v2938_v39, %v2346_v22  ;;  %v2348_v18 = vpop.eup %2347 }
0x17d8   :  { %v1701_v30 = vadd.f32 1.0, %v2348_v18 }
0x17d9   :  { %1624 = vrot.lane.b32.xlu0 %v1622_v24, %s2451_s16 }
0x17da   :  { %2349 = vrcp.f32 %v1701_v30 }
0x17e7   :  { %v2350_v31 = vpop.eup %2349 }
0x181b   :  { %v1721_v17 = vpop.permute.xlu1 %1720 }
0x181c   :  { %v1723_v32 = vmul.f32 %v2350_v31, %v1721_v17 }
0x181e   :  { %1725 = vrot.lane.b32.xlu1 %v1723_v32, %s2452_s25 }
0x184b   :  { %v1625_v23 = vpop.permute.xlu0 %1624 }
0x184c   :  { %v1627_v34 = vmul.f32 %v2342_v4, %v1625_v23 }
0x184e   :  { %1629 = vrot.lane.b32.xlu0 %v1627_v34, %s2452_s25 }
0x1890   :  { %v1726_v33 = vpop.permute.xlu1 %1725 }
0x1891   :  { %v2974_v35 = vadd.f32 %v2344_v11, %v1726_v33 }
0x1893   :  { %v1729_v29 = vpack.c.bf16 %v2974_v35, %v2974_v35 }
0x1895   :  { %v1731_v36 = vrot.slane %v1729_v29, 2 }
0x1897   :  { %1732 = vrot.lane.b32.xlu1 %v1731_v36, %s2450_s15 }
0x18c0   :  { %v1630_v37 = vpop.permute.xlu0 %1629 }
0x18c1   :  { %v2979_v39 = vadd.f32 %v2346_v22, %v1630_v37 }
0x18c3   :  { %v1633_v40 = vpack.c.bf16 %v2979_v39, %v2979_v39 }
0x18c5   :  { %1635 = vrot.lane.b32.xlu0 %v1633_v40, %s2450_s15 }
0x1909   :  { %v1733_v44 = vpop.permute.xlu1 %1732 }
0x190a   :  { %2109 = vmatmul.mubr.msk.bf16.vlgmr.msra.gmra.mxu0 %vm680_vm15, %v1733_v44 }
0x190b   :  { %1924 = vmatpush1.bf16.msra.mxu0 %v2373_v38  ;;  %1943 = vmatprep.mubr.bf16.mxu0 %v2445_v0 }
0x190c   :  { %1925 = vmatprep.subr.bf16.mxu0 %v2374_v8 }
0x190f   :  { %1926 = vmatpush1.bf16.msra.mxu0 %v2375_v9 }
0x1937   :  { %v1636_v10 = vpop.permute.xlu0 %1635 }
0x1938   :  { %2206 = vmatmul.mubr.msk.bf16.vlgmr.msra.gmra.mxu1 %vm680_vm15, %v1636_v10 }
0x1939   :  { %2210 = vmatpush3.bf16.msra.mxu1 %v2764_v2  ;;  %2213 = vmatprep.mubr.msk.bf16.mxu1 %vm2449_vm8, %v2448_v26 }
0x193a   :  { %2211 = vmatprep.subr.bf16.mxu1 %v2448_v26 }
0x193d   :  { %2212 = vmatpush3.bf16.msra.mxu1 %v2770_v15 }
0x193e   :  { %2217 = vmatprep.subr.bf16.mxu1 %v2448_v26 }
0x19ca   :  { %v1771_v0 = vpop.f32.mrf.mxu0 }
0x19cb   :  { %v1772_v43 = vadd.f32 %v1771_v0, %v2727_v20 }
0x19cc   :  { %v1773_v45 = vpop.f32.mrf.mxu0 }
0x19cd   :  { %v1855_v46 = vrot.slane %v1772_v43, 2  ;;  %v1774_v47 = vadd.f32 %v1773_v45, %v2729_v21 }
0x19ce   :  { %v1775_v49 = vpop.f32.mrf.mxu0 }
0x19cf   :  { %1856 = vrot.lane.b32.xlu1 %v1855_v46, %s2452_s25  ;;  %v1867_v50 = vrot.slane %v1774_v47, 2 }
0x19d0   :  { %v1776_v2 = vpop.f32.mrf.mxu0 }
0x19d3   :  { %1878 = vrot.lane.b32.xlu1 %v1867_v50, %s2451_s16 }
0x19f8   :  { %v1674_v51 = vpop.f32.mrf.mxu1 }
0x19f9   :  { %v1675_v15 = vadd.f32 %v3006_v52, %v1674_v51 }
0x19fa   :  { %v2207_v53 = vpop.f32.mrf.mxu1 }
0x19fb   :  { %1786 = vrot.lane.b32.xlu0 %v1675_v15, %s2450_s15  ;;  %v1778_v58 = vadd.f32 %v1772_v43, %v1675_v15 }
0x19fc   :  { %v1677_v54 = vpop.f32.mrf.mxu1 }
0x19fd   :  { %v2110_v60 = vmul.f32 -1.442695, %v1778_v58 }
0x19fe   :  { %v2208_v56 = vpop.f32.mrf.mxu1 }
0x1a41   :  { %v1857_v41 = vpop.permute.xlu1 %1856 }
0x1a42   :  { %v1859_v21 = vadd.f32 %v1857_v41, %v2687_v61 }
0x1a44   :  { %v2112_v59 = vmul.f32 -1.442695, %v1859_v21 }
0x1a45   :  { %v1879_v55 = vpop.permute.xlu1 %1878 }
0x1a46   :  { %2351 = vpow2.f32 %v2112_v59  ;;  %v2248_v59 = vld [vmem:[%s3049_s3 + $0xc] ss:$16 sps:$4 sm:$0xff]  }
0x1a47   :  { %2353 = vpow2.f32 %v2110_v60 }
0x1a53   :  { %v2352_v62 = vpop.eup %2351 }
0x1a54   :  { %v1863_v57 = vadd.f32 1.0, %v2352_v62  ;;  %v2354_v63 = vpop.eup %2353 }
0x1a55   :  { %v1782_v48 = vadd.f32 1.0, %v2354_v63 }
0x1a56   :  { %2355 = vrcp.f32 %v1863_v57 }
0x1a57   :  { %2357 = vrcp.f32 %v1782_v48 }
0x1a63   :  { %v2356_v1 = vpop.eup %2355 }
0x1a64   :  { %v1881_v3 = vmul.f32 %v2356_v1, %v1879_v55  ;;  %v2358_v4 = vpop.eup %2357  ;;  %v2116_v55 = vld [vmem:[#allocation4 + $0x8] ss:$0 sm:$0xff] }
0x1a66   :  { %1883 = vrot.lane.b32.xlu1 %v1881_v3, %s2450_s15 }
0x1a6d   :  { %v1787_v5 = vpop.permute.xlu0 %1786 }
0x1a6e   :  { %v1789_v6 = vmul.f32 %v2358_v4, %v1787_v5 }
0x1a70   :  { %1791 = vrot.lane.b32.xlu0 %v1789_v6, %s2450_s15 }
0x1a74   :  { %1868 = vrot.lane.b32.xlu0 %v1867_v50, %s2452_s25 }
0x1ad8   :  { %v1884_v7 = vpop.permute.xlu1 %1883 }
0x1ad9   :  { %v1886_v27 = vadd.f32 %v1884_v7, %v2687_v61 }
0x1adb   :  { %2359 = vtanh.f32 %v1886_v27 }
0x1ae2   :  { %v1792_v11 = vpop.permute.xlu0 %1791 }
0x1ae3   :  { %v1794_v12 = vadd.f32 %v1792_v11, %v1772_v43 }
0x1ae5   :  { %2361 = vtanh.f32 %v1794_v12 }
0x1ae6   :  { %v1869_v25 = vpop.permute.xlu0 %1868 }
0x1ae7   :  { %v1871_v42 = vadd.f32 %v1869_v25, %v2687_v61 }
0x1ae8   :  { %v2360_v13 = vpop.eup %2359 }
0x1ae9   :  { %v1889_v14 = vrot.slane %v2360_v13, 2  ;;  %v2113_v28 = vmul.f32 -1.442695, %v1871_v42 }
0x1aeb   :  { %v1891_v16 = vsub.f32 %v2974_v35, %v1889_v14  ;;  %2363 = vpow2.f32 %v2113_v28 }
0x1aed   :  { %v1893_v19 = vrot.slane %v1891_v16, 6 }
0x1aef   :  { %1894 = vrot.lane.b32.xlu0 %v1893_v19, %s2451_s16 }
0x1af2   :  { %v2362_v22 = vpop.eup %2361 }
0x1af3   :  { %v1796_v24 = vsub.f32 %v2979_v39, %v2362_v22 }
0x1af5   :  { %1798 = vrot.lane.b32.xlu1 %v1796_v24, %s2451_s16 }
0x1af8   :  { %v2364_v18 = vpop.eup %2363 }
0x1af9   :  { %v1875_v30 = vadd.f32 1.0, %v2364_v18 }
0x1afb   :  { %2365 = vrcp.f32 %v1875_v30 }
0x1b08   :  { %v2366_v31 = vpop.eup %2365 }
0x1b61   :  { %v1895_v17 = vpop.permute.xlu0 %1894 }
0x1b62   :  { %v1897_v32 = vmul.f32 %v2366_v31, %v1895_v17 }
0x1b64   :  { %1899 = vrot.lane.b32.xlu0 %v1897_v32, %s2452_s25 }
0x1b67   :  { %v1799_v23 = vpop.permute.xlu1 %1798 }
0x1b68   :  { %v1801_v34 = vmul.f32 %v2358_v4, %v1799_v23 }
0x1b6a   :  { %1803 = vrot.lane.b32.xlu1 %v1801_v34, %s2452_s25 }
0x1bd6   :  { %v1900_v33 = vpop.permute.xlu0 %1899 }
0x1bd7   :  { %v1902_v35 = vadd.f32 %v2360_v13, %v1900_v33 }
0x1bd9   :  { %v1903_v29 = vpack.c.bf16 %v1902_v35, %v1902_v35 }
0x1bdb   :  { %v1905_v36 = vrot.slane %v1903_v29, 3 }
0x1bdc   :  { %v1804_v37 = vpop.permute.xlu1 %1803 }
0x1bdd   :  { %v1806_v61 = vadd.f32 %v2362_v22, %v1804_v37  ;;  %1906 = vrot.lane.b32.xlu0 %v1905_v36, %s2450_s15 }
0x1bdf   :  { %v1807_v39 = vpack.c.bf16 %v1806_v61, %v1806_v61 }
0x1be1   :  { %1809 = vrot.lane.b32.xlu1 %v1807_v39, %s2450_s15 }
0x1c4f   :  { %v1907_v40 = vpop.permute.xlu0 %1906 }
0x1c50   :  { %2114 = vmatmul.mubr.msk.bf16.vlgmr.msra.gmra.mxu0 %vm680_vm15, %v1907_v40 }
0x1c53   :  { %v1810_v44 = vpop.permute.xlu1 %1809 }
0x1c54   :  { %2214 = vmatmul.mubr.msk.bf16.vlgmr.msra.gmra.mxu1 %vm680_vm15, %v1810_v44 }
0x1c55   :  { %2221 = vmatprep.mubr.msk.bf16.mxu1 %vm2449_vm8, %v2448_v26 }
0x1d10   :  { %v1945_v38 = vpop.f32.mrf.mxu0 }
0x1d11   :  { %v1946_v49 = vadd.f32 %v1945_v38, %v2727_v20  ;;  %v2247_v20 = vld [vmem:[%s3049_s3 + $0x2c] ss:$16 sps:$4 sm:$0xff]   ;;  %s2417_s3 = scalar_lea.vmem %s2054_s13, 32 }
0x1d12   :  { %v1947_v8 = vpop.f32.mrf.mxu0  ;;  %2218 = vmatpush3.bf16.msra.mxu1 %v2247_v20  ;;  %p2418_p10 = scmp.ne.s32.totalorder %s2054_s13, %s2417_s3  ;;  %p2423_p12 = scmp.lt.s32.totalorder %s2417_s3, %s2417_s3 }
0x1d13   :  { %2219 = vmatprep.subr.bf16.mxu1 %v2448_v26 }
0x1d14   :  { %v1848_v9 = vpop.f32.mrf.mxu1  ;;  %v1948_v10 = vpop.f32.mrf.mxu0  ;;  %p2424_p13 = por %p2423_p12, %p2422_p11 }
0x1d15   :  { %v1849_v0 = vadd.f32 %v3006_v52, %v1848_v9 }
0x1d16   :  { %v2215_v43 = vpop.f32.mrf.mxu1  ;;  %v1949_v45 = vpop.f32.mrf.mxu0  ;;  %2220 = vmatpush3.bf16.msra.mxu1 %v2248_v59  ;;  %p2425_p0 = pnand %p2424_p13, %p2418_p10 }
0x1d17   :  { %1959 = vrot.lane.b32.xlu1 %v1849_v0, %s2450_s15  ;;  %v1951_v2 = vadd.f32 %v1946_v49, %v1849_v0 }
0x1d18   :  { %v1851_v46 = vpop.f32.mrf.mxu1 }
0x1d19   :  { %v2115_v50 = vmul.f32 -1.442695, %v1951_v2 }
0x1d1a   :  { %v2216_v47 = vpop.f32.mrf.mxu1 }
0x1d1b   :  { %2367 = vpow2.f32 %v2115_v50 }
0x1d28   :  { %v2368_v51 = vpop.eup %2367 }
0x1d29   :  { %v1955_v15 = vadd.f32 1.0, %v2368_v51 }
0x1d2b   :  { %2369 = vrcp.f32 %v1955_v15 }
0x1d38   :  { %v2370_v53 = vpop.eup %2369 }
0x1d89   :  { %v1960_v54 = vpop.permute.xlu1 %1959 }
0x1d8a   :  { %v1962_v56 = vmul.f32 %v2370_v53, %v1960_v54 }
0x1d8c   :  { %1964 = vrot.lane.b32.xlu0 %v1962_v56, %s2450_s15 }
0x1dfe   :  { %v1965_v52 = vpop.permute.xlu0 %1964 }
0x1dff   :  { %v1967_v41 = vadd.f32 %v1965_v52, %v1946_v49 }
0x1e01   :  { %2371 = vtanh.f32 %v1967_v41 }
0x1e0e   :  { %v2372_v21 = vpop.eup %2371 }
0x1e0f   :  { %v1969_v58 = vsub.f32 %v1806_v61, %v2372_v21 }
0x1e11   :  { %1971 = vrot.lane.b32.xlu1 %v1969_v58, %s2451_s16 }
0x1e83   :  { %v1972_v60 = vpop.permute.xlu1 %1971 }
0x1e84   :  { %v1974_v62 = vmul.f32 %v2370_v53, %v1972_v60 }
0x1e86   :  { %1976 = vrot.lane.b32.xlu0 %v1974_v62, %s2452_s25 }
0x1ef8   :  { %v1977_v57 = vpop.permute.xlu0 %1976 }
0x1ef9   :  { %v1979_v63 = vadd.f32 %v2372_v21, %v1977_v57 }
0x1efb   :  { %v1980_v48 = vpack.c.bf16 %v1979_v63, %v1979_v63 }
0x1efd   :  { %1988 = vrot.lane.b32.xlu1 %v1980_v48, %s2450_s15 }
0x1f6f   :  { %v1989_v1 = vpop.permute.xlu1 %1988 }
0x1f70   :  { %2222 = vmatmul.mubr.msk.bf16.vlgmr.msra.gmra.mxu1 %vm680_vm15, %v1989_v1 }
0x2030   :  { %v2039_v3 = vpop.f32.mrf.mxu1 }
0x2031   :  { %v2040_v4 = vadd.f32 %v2116_v55, %v2039_v3 }
0x2032   :  { %v2223_v26 = vpop.f32.mrf.mxu1 }
0x2033   :  { %2046 = vst.msk [vmem:[#allocation9] sm:$0x3] %vm2045_vm0, %v2040_v4 }
0x2034   :  { %v2042_v5 = vpop.f32.mrf.mxu1 }
0x2035   :  { %2428 = shalt.err (!%p2425_p0)
}
0x2036   :  { %2056 = dma.vmem_to_hbm [thread:$0]  %s2054_s13, 32, %s3050_s4, [#allocation6]   ;;  %v2224_v6 = vpop.f32.mrf.mxu1 }
0x2037   :  { %2441 = dma.done.wait [#allocation6], 32  }
0x2038   :  { %2442 = vsyncadd [#allocation6], 4294967264 }
0x2039   :  { %2060 = vsyncpa [#allocation5], 1 }
0x203a   :  { %2061 = vsyncpa [#allocation8], 1 }
0x203b   :  { %2062 = vsyncpa [#allocation6], 1 }

</bundles_post_ra>
